<compile_context>
chip_gen: v7x
topology: tpu7x:2x2x1
jax: 0.10.0
libtpu: 0.0.40
codegen_flags: <defaults>
</compile_context>

<pallas_src>
import functools
import math

import jax
import jax.numpy as jnp
from jax import lax
from jax.experimental import pallas as pl
from jax.experimental.pallas import tpu as pltpu


# ----------------------------- tiling helpers -------------------------------

def _choose_parallel_tile(n, max_tile, unit=8):
    """Tile for a 'parallel' grid axis.

    Divides n, is a multiple of `unit` (sublane granularity) unless it is the
    full extent, is capped at `max_tile`, and prefers leaving >= 2 blocks so
    both v7x TensorCores get work (harmless on 1-TC v5e/v6e).
    """
    if n <= unit:
        return n
    divs = [d for d in range(unit, min(n, max_tile) + 1, unit) if n % d == 0]
    if not divs:
        return n
    two_block = [d for d in divs if n // d >= 2]
    return max(two_block) if two_block else max(divs)


def _choose_img_tk(P, tm, D, c_pad, vmem_budget_bytes):
    """Largest multiple-of-128 divisor of P whose double-buffered bf16 tiles
    fit the VMEM budget (budget chosen for the 64 MiB/TC v7x case)."""
    # invariant / output blocks: tn (c_pad, D) bf16 x2, out (tm, c_pad) f32 x2,
    # acc (tm, D) f32.
    fixed = 2 * c_pad * D * 2 + 2 * tm * c_pad * 4 + tm * D * 4
    best = None
    tk = 128
    while tk <= P:
        if P % tk == 0:
            need = fixed + 2 * (tm * tk + tk * D) * 2   # bf16 x/w, double-buffered
            if need <= vmem_budget_bytes:
                best = tk
        tk += 128
    if best is None:
        # tiny P (< 128) or no multiple-of-128 divisor: fall back to full width.
        best = P
    return best


# ----------------------------- Pallas kernels -------------------------------

def graph_learner_kernel(t_ref, clus_t_ref, xnc_t_ref, deg_t_ref,
                         clus_i_ref, xnc_i_ref, deg_i_ref,
                         w_tt_ref, b_tt_ref, w_it_ref, b_it_ref,
                         out_ref, *, alpha_it, beta_it):
    """Grid: (C tiles,) ["parallel"].  Emits blended + L2-normalized text
    features (C_tile, D).  The 4-cluster mean and the tt/it branch blend are a
    fully unrolled in-kernel loop (no grid reduction axis, no scratch)."""
    t = t_ref[...]                                               # (Ct, D) f32
    # L2-normalize the text node once; shared by all 8 GCN evaluations.
    t_inv = lax.rsqrt(jnp.maximum(jnp.sum(t * t, -1, keepdims=True), 1e-24))
    xn_t = t * t_inv                                             # (Ct, D)
    a00 = jnp.sum(xn_t * xn_t, -1, keepdims=True)                # (Ct, 1) ~ 1
    adj00 = jnp.maximum(a00, 0.0) + 1.0                          # + self loop

    w_tt = w_tt_ref[...]                                         # (D, D) bf16
    w_it = w_it_ref[...]
    b_tt = b_tt_ref[...]                                         # (Ct, D) f32
    b_it = b_it_ref[...]

    def gcn_node0(clus_bf16, xn_c, deg_c, w_bf16, b):
        # clus_bf16: (G, D) raw cluster features (bf16 MXU operand)
        # xn_c     : (G, D) f32 normalized clusters (adjacency, precomputed)
        # deg_c    : (1, G) f32 cluster degree term sum(relu(s_cc),-1)+1
        # cosine-similarity edges text<->cluster, f32 for degree accuracy.
        s0 = lax.dot_general(xn_t, xn_c, (((1,), (1,)), ((), ())),
                             preferred_element_type=jnp.float32)     # (Ct, G)
        r0 = jnp.maximum(s0, 0.0)                                    # clipped
        d0 = adj00 + jnp.sum(r0, -1, keepdims=True)                  # (Ct, 1)
        dinv0 = lax.rsqrt(d0)                                        # (Ct, 1)
        dinv_cl = lax.rsqrt(r0 + deg_c)                              # (Ct, G)
        # Only row 0 of (D^-1/2 A D^-1/2) @ (feat @ W) is kept by the module;
        # aggregate node-0 features first, apply the GCN weight once.
        wg = r0 * dinv_cl                                            # (Ct, G)
        agg = dinv0 * (adj00 * dinv0 * t
                       + jnp.dot(wg.astype(jnp.bfloat16), clus_bf16,
                                 preferred_element_type=jnp.float32))
        out0 = jnp.dot(agg.astype(jnp.bfloat16), w_bf16,
                       preferred_element_type=jnp.float32) + b
        return jnp.tanh(out0)                                        # (Ct, D)

    # Accumulate each branch immediately so g_tt / g_it are never live at the
    # same time (keeps vreg pressure down at large D).
    acc = jnp.zeros_like(t)
    for k in range(4):                                    # fully unrolled
        acc = acc + alpha_it * gcn_node0(
            clus_t_ref[k], xnc_t_ref[k], deg_t_ref[k], w_tt, b_tt)
        acc = acc + (1.0 - alpha_it) * gcn_node0(
            clus_i_ref[k], xnc_i_ref[k], deg_i_ref[k], w_it, b_it)

    graph_o = acc * 0.25
    text = beta_it * t + (1.0 - beta_it) * graph_o
    inv = lax.rsqrt(jnp.maximum(jnp.sum(text * text, -1, keepdims=True), 1e-24))
    out_ref[...] = (text * inv).astype(out_ref.dtype)


def encode_logits_kernel(x_ref, w_ref, tn_ref, o_ref, acc_ref,
                         *, logit_scale_exp):
    """Image projection (bf16 MXU operands, f32 accumulator, reduced over P
    tiles) fused with L2-normalize + logits matmul on the last reduction step.
    """
    k = pl.program_id(1)

    @pl.when(k == 0)
    def _():
        acc_ref[...] = jnp.zeros_like(acc_ref)

    acc_ref[...] += jnp.dot(x_ref[...], w_ref[...],
                            preferred_element_type=jnp.float32)

    @pl.when(k == pl.num_programs(1) - 1)
    def _():
        img = acc_ref[...]
        img_n = img * lax.rsqrt(
            jnp.maximum(jnp.sum(img * img, -1, keepdims=True), 1e-24))
        logits = lax.dot_general(img_n.astype(jnp.bfloat16), tn_ref[...],
                                 (((1,), (1,)), ((), ())),
                                 preferred_element_type=jnp.float32)
        o_ref[...] = (logit_scale_exp * logits).astype(o_ref.dtype)


# ------------------------------- wrappers ------------------------------------

def run_graph_learner(base_text, base_img, w_tt, b_tt, w_it, b_it,
                      alpha_it, beta_it, *, c_tile=None):
    C, D = base_text.shape
    assert C % 4 == 0
    G = C // 4
    if c_tile is None:
        # smaller tiles for large D keep all (c_tile, D) intermediates in vregs.
        c_tile = _choose_parallel_tile(C, max_tile=128 if D <= 256 else 64)
    assert C % c_tile == 0

    def prep(base):
        # (4, G, D) cluster node sets: clus[k, g] = base[4*g + k].  No
        # C-replicated (4, C, N, D) broadcast tensor is ever built in HBM.
        clus = jnp.transpose(base.reshape(G, 4, D), (1, 0, 2))
        inv = lax.rsqrt(
            jnp.maximum(jnp.sum(clus * clus, -1, keepdims=True), 1e-24))
        xn = clus * inv                                           # (4, G, D)
        # class-independent cluster<->cluster degree term, precomputed once.
        s_cc = jnp.einsum('kgd,khd->kgh', xn, xn)                 # (4, G, G)
        deg = (jnp.sum(jnp.maximum(s_cc, 0.0), -1) + 1.0)[:, None, :]  # (4,1,G)
        return clus.astype(jnp.bfloat16), xn, deg

    clus_t, xnc_t, deg_t = prep(base_text)
    clus_i, xnc_i, deg_i = prep(base_img)

    kernel = functools.partial(graph_learner_kernel,
                               alpha_it=float(alpha_it),
                               beta_it=float(beta_it))
    full3 = lambda c: (0, 0, 0)
    return pl.pallas_call(
        kernel,
        out_shape=jax.ShapeDtypeStruct((C, D), jnp.float32),
        grid_spec=pltpu.PrefetchScalarGridSpec(
            num_scalar_prefetch=0,
            grid=(C // c_tile,),
            in_specs=[
                pl.BlockSpec((c_tile, D), lambda c: (c, 0)),    # base_text
                pl.BlockSpec((4, G, D), full3),                 # clus_t (bf16)
                pl.BlockSpec((4, G, D), full3),                 # xn clus_t
                pl.BlockSpec((4, 1, G), full3),                 # deg_t
                pl.BlockSpec((4, G, D), full3),                 # clus_i (bf16)
                pl.BlockSpec((4, G, D), full3),                 # xn clus_i
                pl.BlockSpec((4, 1, G), full3),                 # deg_i
                pl.BlockSpec((D, D), lambda c: (0, 0)),         # w_tt (bf16)
                pl.BlockSpec((c_tile, D), lambda c: (c, 0)),    # b_tt
                pl.BlockSpec((D, D), lambda c: (0, 0)),         # w_it (bf16)
                pl.BlockSpec((c_tile, D), lambda c: (c, 0)),    # b_it
            ],
            out_specs=pl.BlockSpec((c_tile, D), lambda c: (c, 0))),
        compiler_params=pltpu.CompilerParams(
            dimension_semantics=("parallel",),
            vmem_limit_bytes=48 * 1024 * 1024),
    )(base_text, clus_t, xnc_t, deg_t, clus_i, xnc_i, deg_i,
      w_tt.astype(jnp.bfloat16), b_tt, w_it.astype(jnp.bfloat16), b_it)


def encode_image_and_logits(image, w_img, text_n, logit_scale_exp,
                            *, tm=None, tk=None):
    # TODO(synk): the pretrained CLIP ViT visual encoder has no clean in-script
    # equivalent; it is replaced by a single linear projection of the flattened
    # image.  The GraphAdapter compute is reproduced exactly.
    B = image.shape[0]
    P, D = w_img.shape
    C = text_n.shape[0]

    # Pad the class axis to a multiple of 128 so the logits output block and
    # the text-feature block are lane-dense (unmasked vst); padded rows are
    # zero -> padded logits are exactly 0 and sliced off below.
    C_pad = max(128, ((C + 127) // 128) * 128)
    if C_pad != C:
        text_n = jnp.pad(text_n, ((0, C_pad - C), (0, 0)))

    # bf16 MXU operands, f32 accumulation (halves the dominant w_img stream).
    x = image.reshape(B, -1).astype(jnp.bfloat16)
    assert x.shape[1] == P
    w_bf = w_img.astype(jnp.bfloat16)
    tn_bf = text_n.astype(jnp.bfloat16)

    if tm is None:
        tm = _choose_parallel_tile(B, max_tile=256)
    assert B % tm == 0
    if tk is None:
        tk = _choose_img_tk(P, tm, D, C_pad,
                            vmem_budget_bytes=32 * 1024 * 1024)  # v7x-safe
    assert P % tk == 0

    kernel = functools.partial(encode_logits_kernel,
                               logit_scale_exp=float(logit_scale_exp))
    logits = pl.pallas_call(
        kernel,
        out_shape=jax.ShapeDtypeStruct((B, C_pad), jnp.float32),
        grid_spec=pltpu.PrefetchScalarGridSpec(
            num_scalar_prefetch=0,
            grid=(B // tm, P // tk),
            in_specs=[pl.BlockSpec((tm, tk), lambda i, k: (i, k)),   # x tile
                      pl.BlockSpec((tk, D), lambda i, k: (k, 0)),    # w_img
                      pl.BlockSpec((C_pad, D), lambda i, k: (0, 0))],  # text_n
            out_specs=pl.BlockSpec((tm, C_pad), lambda i, k: (i, 0)),
            scratch_shapes=[pltpu.VMEM((tm, D), jnp.float32)]),
        compiler_params=pltpu.CompilerParams(
            dimension_semantics=("parallel", "arbitrary"),
            vmem_limit_bytes=48 * 1024 * 1024),
    )(x, w_bf, tn_bf)
    return logits[:, :C]


def custom_clip_forward(image, w_img, base_text, base_img,
                        w_tt, b_tt, w_it, b_it,
                        alpha_it, beta_it, logit_scale):
    text_n = run_graph_learner(base_text, base_img, w_tt, b_tt, w_it, b_it,
                               alpha_it, beta_it)                 # (C, D), L2-normed
    return encode_image_and_logits(image, w_img, text_n,
                                   math.exp(logit_scale))         # (B, C)


# ----------------------- pure-JAX reference (checking) -----------------------

def reference_forward(image, w_img, base_text, base_img,
                      w_tt, b_tt, w_it, b_it, alpha_it, beta_it, logit_scale):
    B = image.shape[0]
    img_feat = image.reshape(B, -1) @ w_img
    C, D = base_text.shape
    G = C // 4
    node_t = base_text.reshape(1, G, 4, D)
    node_i = base_img.reshape(1, G, 4, D)

    def gcn(feat, w, b):
        xn = feat / jnp.maximum(
            jnp.linalg.norm(feat, axis=-1, keepdims=True), 1e-12)
        A = jnp.einsum('cnd,cmd->cnm', xn, xn)
        n = A.shape[-1]
        adj = jnp.maximum(A, 0.0) + jnp.eye(n)[None]
        dinv = jnp.power(jnp.sum(adj, -1), -0.5)
        adj_n = dinv[:, :, None] * adj * dinv[:, None, :]
        out = jnp.einsum('cnm,cmd->cnd', adj_n, feat @ w) + b[:, None, :]
        return jnp.tanh(out[:, 0, :])

    g_all = []
    for index in range(4):
        inputs_text = base_text[:, None, :]
        clus_t = jnp.broadcast_to(node_t[:, :, index, :], (C, G, D))
        clus_i = jnp.broadcast_to(node_i[:, :, index, :], (C, G, D))
        feat_tt = jnp.concatenate([inputs_text, clus_t], axis=1)
        feat_it = jnp.concatenate([inputs_text, clus_i], axis=1)
        g_all.append(alpha_it * gcn(feat_tt, w_tt, b_tt)
                     + (1.0 - alpha_it) * gcn(feat_it, w_it, b_it))
    graph_o = jnp.mean(jnp.stack(g_all, 0), 0)
    text = beta_it * base_text + (1.0 - beta_it) * graph_o
    img_n = img_feat / jnp.linalg.norm(img_feat, axis=-1, keepdims=True)
    text_n = text / jnp.linalg.norm(text, axis=-1, keepdims=True)
    return math.exp(logit_scale) * img_n @ text_n.T


# ---------------------------------- main --------------------------------------

if __name__ == "__main__":
    B, C, D, H, W = 8, 8, 128, 16, 16       # C must be divisible by 4
    P = 3 * H * W

    key = jax.random.PRNGKey(0)
    ks = jax.random.split(key, 6)
    image = jax.random.normal(ks[0], (B, 3, H, W), jnp.float32)
    w_img = jax.random.normal(ks[1], (P, D), jnp.float32) * 0.02
    base_text = jax.random.normal(ks[2], (C, D), jnp.float32)
    base_img = jax.random.normal(ks[3], (C, D), jnp.float32)
    stdv = 1.0 / math.sqrt(D)               # GraphConvolution.reset_parameters
    w_tt = jax.random.uniform(ks[4], (D, D), jnp.float32, -stdv, stdv)
    w_it = jax.random.uniform(ks[5], (D, D), jnp.float32, -stdv, stdv)
    b_tt = jnp.zeros((C, D), jnp.float32)   # gcn_bias init = zeros
    b_it = jnp.zeros((C, D), jnp.float32)

    alpha_it = 0.7                          # GraphLearner.alpha_it
    beta_it = 0.5                           # cfg.TRAINER.GRAPHADAPTER.BETA
    logit_scale = math.log(1.0 / 0.07)      # CLIP logit_scale init

    logits = custom_clip_forward(image, w_img, base_text, base_img,
                                 w_tt, b_tt, w_it, b_it,
                                 alpha_it, beta_it, logit_scale)
    logits = jax.block_until_ready(logits)

    ref = reference_forward(image, w_img, base_text, base_img,
                            w_tt, b_tt, w_it, b_it,
                            alpha_it, beta_it, logit_scale)
    assert logits.shape == (B, C)
    # bf16 MXU operands (f32 accumulation) -> slightly looser tolerance.
    err = jnp.max(jnp.abs(logits - ref))
    assert jnp.allclose(logits, ref, atol=3e-2, rtol=3e-2), ("max|diff|", err)
    print("KERNEL_OK")
</pallas_src>

<mosaic_0001>
module attributes {stable_mosaic.version = 11 : i64} {
  func.func @graph_learner_kernel(%arg0: i32, %arg1: memref<8x128xf32, #tpu.memory_space<vmem>>, %arg2: memref<4x2x128xbf16, #tpu.memory_space<vmem>>, %arg3: memref<4x2x128xf32, #tpu.memory_space<vmem>>, %arg4: memref<4x1x2xf32, #tpu.memory_space<vmem>>, %arg5: memref<4x2x128xbf16, #tpu.memory_space<vmem>>, %arg6: memref<4x2x128xf32, #tpu.memory_space<vmem>>, %arg7: memref<4x1x2xf32, #tpu.memory_space<vmem>>, %arg8: memref<128x128xbf16, #tpu.memory_space<vmem>>, %arg9: memref<8x128xf32, #tpu.memory_space<vmem>>, %arg10: memref<128x128xbf16, #tpu.memory_space<vmem>>, %arg11: memref<8x128xf32, #tpu.memory_space<vmem>>, %arg12: memref<8x128xf32, #tpu.memory_space<vmem>>) attributes {dimension_semantics = [#tpu.dimension_semantics<parallel>], iteration_bounds = array<i64: 1>, scalar_prefetch = 0 : i64, scratch_operands = 0 : i64, tpu.core_type = #tpu.core_type<tc>, window_params = [{transform_indices = @transform_0, window_bounds = array<i64: 8, 128>}, {pipeline_mode = #tpu.pipeline_mode<synchronous>, transform_indices = @transform_1, window_bounds = array<i64: 4, 2, 128>}, {pipeline_mode = #tpu.pipeline_mode<synchronous>, transform_indices = @transform_2, window_bounds = array<i64: 4, 2, 128>}, {pipeline_mode = #tpu.pipeline_mode<synchronous>, transform_indices = @transform_3, window_bounds = array<i64: 4, 1, 2>}, {pipeline_mode = #tpu.pipeline_mode<synchronous>, transform_indices = @transform_4, window_bounds = array<i64: 4, 2, 128>}, {pipeline_mode = #tpu.pipeline_mode<synchronous>, transform_indices = @transform_5, window_bounds = array<i64: 4, 2, 128>}, {pipeline_mode = #tpu.pipeline_mode<synchronous>, transform_indices = @transform_6, window_bounds = array<i64: 4, 1, 2>}, {pipeline_mode = #tpu.pipeline_mode<synchronous>, transform_indices = @transform_7, window_bounds = array<i64: 128, 128>}, {transform_indices = @transform_8, window_bounds = array<i64: 8, 128>}, {pipeline_mode = #tpu.pipeline_mode<synchronous>, transform_indices = @transform_9, window_bounds = array<i64: 128, 128>}, {transform_indices = @transform_10, window_bounds = array<i64: 8, 128>}, {transform_indices = @transform_11, window_bounds = array<i64: 8, 128>}]} {
    %c0 = arith.constant 0 : index
    %c0_0 = arith.constant 0 : index
    %0 = vector.load %arg1[%c0, %c0_0] : memref<8x128xf32, #tpu.memory_space<vmem>>, vector<8x128xf32>
    %1 = arith.mulf %0, %0 : vector<8x128xf32>
    %cst = arith.constant dense<0.000000e+00> : vector<8xf32>
    %2 = vector.multi_reduction <add>, %1, %cst [1] : vector<8x128xf32> to vector<8xf32>
    %3 = vector.shape_cast %2 : vector<8xf32> to vector<8x1xf32>
    %cst_1 = arith.constant 1.000000e-24 : f32
    %4 = vector.broadcast %cst_1 : f32 to vector<8x1xf32>
    %5 = arith.maximumf %3, %4 : vector<8x1xf32>
    %6 = math.rsqrt %5 : vector<8x1xf32>
    %7 = vector.broadcast %6 : vector<8x1xf32> to vector<8x128xf32>
    %8 = arith.mulf %0, %7 : vector<8x128xf32>
    %9 = arith.mulf %8, %8 : vector<8x128xf32>
    %cst_2 = arith.constant dense<0.000000e+00> : vector<8xf32>
    %10 = vector.multi_reduction <add>, %9, %cst_2 [1] : vector<8x128xf32> to vector<8xf32>
    %11 = vector.shape_cast %10 : vector<8xf32> to vector<8x1xf32>
    %cst_3 = arith.constant 0.000000e+00 : f32
    %12 = vector.broadcast %cst_3 : f32 to vector<8x1xf32>
    %13 = arith.maximumf %11, %12 : vector<8x1xf32>
    %cst_4 = arith.constant 1.000000e+00 : f32
    %14 = vector.broadcast %cst_4 : f32 to vector<8x1xf32>
    %15 = arith.addf %13, %14 : vector<8x1xf32>
    %c0_5 = arith.constant 0 : index
    %c0_6 = arith.constant 0 : index
    %16 = vector.load %arg8[%c0_5, %c0_6] : memref<128x128xbf16, #tpu.memory_space<vmem>>, vector<128x128xbf16>
    %c0_7 = arith.constant 0 : index
    %c0_8 = arith.constant 0 : index
    %17 = vector.load %arg10[%c0_7, %c0_8] : memref<128x128xbf16, #tpu.memory_space<vmem>>, vector<128x128xbf16>
    %c0_9 = arith.constant 0 : index
    %c0_10 = arith.constant 0 : index
    %18 = vector.load %arg9[%c0_9, %c0_10] : memref<8x128xf32, #tpu.memory_space<vmem>>, vector<8x128xf32>
    %c0_11 = arith.constant 0 : index
    %c0_12 = arith.constant 0 : index
    %19 = vector.load %arg11[%c0_11, %c0_12] : memref<8x128xf32, #tpu.memory_space<vmem>>, vector<8x128xf32>
    %cst_13 = arith.constant 0.000000e+00 : f32
    %20 = vector.broadcast %cst_13 : f32 to vector<8x128xf32>
    %c0_14 = arith.constant 0 : index
    %c0_15 = arith.constant 0 : index
    %c0_16 = arith.constant 0 : index
    %21 = vector.load %arg2[%c0_14, %c0_15, %c0_16] : memref<4x2x128xbf16, #tpu.memory_space<vmem>>, vector<1x2x128xbf16>
    %22 = vector.shape_cast %21 : vector<1x2x128xbf16> to vector<2x128xbf16>
    %c0_17 = arith.constant 0 : index
    %c0_18 = arith.constant 0 : index
    %c0_19 = arith.constant 0 : index
    %23 = vector.load %arg3[%c0_17, %c0_18, %c0_19] : memref<4x2x128xf32, #tpu.memory_space<vmem>>, vector<1x2x128xf32>
    %24 = vector.shape_cast %23 : vector<1x2x128xf32> to vector<2x128xf32>
    %c0_20 = arith.constant 0 : index
    %c0_21 = arith.constant 0 : index
    %c0_22 = arith.constant 0 : index
    %25 = vector.load %arg4[%c0_20, %c0_21, %c0_22] : memref<4x1x2xf32, #tpu.memory_space<vmem>>, vector<1x1x2xf32>
    %26 = vector.shape_cast %25 : vector<1x1x2xf32> to vector<1x2xf32>
    %cst_23 = arith.constant dense<0.000000e+00> : vector<8x2xf32>
    %27 = tpu.matmul %8, %24, %cst_23 {dimension_numbers = #tpu.dot_dimension_numbers<[1], [1], [0], [0], [0, 0, 1, 0], [], []>} : vector<8x128xf32>, vector<2x128xf32>, vector<8x2xf32> -> vector<8x2xf32>
    %cst_24 = arith.constant 0.000000e+00 : f32
    %28 = vector.broadcast %cst_24 : f32 to vector<8x2xf32>
    %29 = arith.maximumf %27, %28 : vector<8x2xf32>
    %cst_25 = arith.constant dense<0.000000e+00> : vector<8xf32>
    %30 = vector.multi_reduction <add>, %29, %cst_25 [1] : vector<8x2xf32> to vector<8xf32>
    %31 = vector.shape_cast %30 : vector<8xf32> to vector<8x1xf32>
    %32 = arith.addf %15, %31 : vector<8x1xf32>
    %33 = math.rsqrt %32 : vector<8x1xf32>
    %34 = vector.broadcast %26 : vector<1x2xf32> to vector<8x2xf32>
    %35 = arith.addf %29, %34 : vector<8x2xf32>
    %36 = math.rsqrt %35 : vector<8x2xf32>
    %37 = arith.mulf %29, %36 : vector<8x2xf32>
    %38 = arith.mulf %15, %33 : vector<8x1xf32>
    %39 = vector.broadcast %38 : vector<8x1xf32> to vector<8x128xf32>
    %40 = arith.mulf %39, %0 : vector<8x128xf32>
    %41 = arith.truncf %37 : vector<8x2xf32> to vector<8x2xbf16>
    %cst_26 = arith.constant dense<0.000000e+00> : vector<8x128xf32>
    %42 = tpu.matmul %41, %22, %cst_26 {dimension_numbers = #tpu.dot_dimension_numbers<[1], [0], [0], [1], [0, 0, 1, 1], [], []>} : vector<8x2xbf16>, vector<2x128xbf16>, vector<8x128xf32> -> vector<8x128xf32>
    %43 = arith.addf %40, %42 : vector<8x128xf32>
    %44 = vector.broadcast %33 : vector<8x1xf32> to vector<8x128xf32>
    %45 = arith.mulf %44, %43 : vector<8x128xf32>
    %46 = arith.truncf %45 : vector<8x128xf32> to vector<8x128xbf16>
    %cst_27 = arith.constant dense<0.000000e+00> : vector<8x128xf32>
    %47 = tpu.matmul %46, %16, %cst_27 {dimension_numbers = #tpu.dot_dimension_numbers<[1], [0], [0], [1], [0, 0, 1, 1], [], []>} : vector<8x128xbf16>, vector<128x128xbf16>, vector<8x128xf32> -> vector<8x128xf32>
    %48 = arith.addf %47, %18 : vector<8x128xf32>
    %49 = math.tanh %48 : vector<8x128xf32>
    %cst_28 = arith.constant 0.699999988 : f32
    %50 = vector.broadcast %cst_28 : f32 to vector<8x128xf32>
    %51 = arith.mulf %50, %49 : vector<8x128xf32>
    %52 = arith.addf %20, %51 : vector<8x128xf32>
    %c0_29 = arith.constant 0 : index
    %c0_30 = arith.constant 0 : index
    %c0_31 = arith.constant 0 : index
    %53 = vector.load %arg5[%c0_29, %c0_30, %c0_31] : memref<4x2x128xbf16, #tpu.memory_space<vmem>>, vector<1x2x128xbf16>
    %54 = vector.shape_cast %53 : vector<1x2x128xbf16> to vector<2x128xbf16>
    %c0_32 = arith.constant 0 : index
    %c0_33 = arith.constant 0 : index
    %c0_34 = arith.constant 0 : index
    %55 = vector.load %arg6[%c0_32, %c0_33, %c0_34] : memref<4x2x128xf32, #tpu.memory_space<vmem>>, vector<1x2x128xf32>
    %56 = vector.shape_cast %55 : vector<1x2x128xf32> to vector<2x128xf32>
    %c0_35 = arith.constant 0 : index
    %c0_36 = arith.constant 0 : index
    %c0_37 = arith.constant 0 : index
    %57 = vector.load %arg7[%c0_35, %c0_36, %c0_37] : memref<4x1x2xf32, #tpu.memory_space<vmem>>, vector<1x1x2xf32>
    %58 = vector.shape_cast %57 : vector<1x1x2xf32> to vector<1x2xf32>
    %cst_38 = arith.constant dense<0.000000e+00> : vector<8x2xf32>
    %59 = tpu.matmul %8, %56, %cst_38 {dimension_numbers = #tpu.dot_dimension_numbers<[1], [1], [0], [0], [0, 0, 1, 0], [], []>} : vector<8x128xf32>, vector<2x128xf32>, vector<8x2xf32> -> vector<8x2xf32>
    %cst_39 = arith.constant 0.000000e+00 : f32
    %60 = vector.broadcast %cst_39 : f32 to vector<8x2xf32>
    %61 = arith.maximumf %59, %60 : vector<8x2xf32>
    %cst_40 = arith.constant dense<0.000000e+00> : vector<8xf32>
    %62 = vector.multi_reduction <add>, %61, %cst_40 [1] : vector<8x2xf32> to vector<8xf32>
    %63 = vector.shape_cast %62 : vector<8xf32> to vector<8x1xf32>
    %64 = arith.addf %15, %63 : vector<8x1xf32>
    %65 = math.rsqrt %64 : vector<8x1xf32>
    %66 = vector.broadcast %58 : vector<1x2xf32> to vector<8x2xf32>
    %67 = arith.addf %61, %66 : vector<8x2xf32>
    %68 = math.rsqrt %67 : vector<8x2xf32>
    %69 = arith.mulf %61, %68 : vector<8x2xf32>
    %70 = arith.mulf %15, %65 : vector<8x1xf32>
    %71 = vector.broadcast %70 : vector<8x1xf32> to vector<8x128xf32>
    %72 = arith.mulf %71, %0 : vector<8x128xf32>
    %73 = arith.truncf %69 : vector<8x2xf32> to vector<8x2xbf16>
    %cst_41 = arith.constant dense<0.000000e+00> : vector<8x128xf32>
    %74 = tpu.matmul %73, %54, %cst_41 {dimension_numbers = #tpu.dot_dimension_numbers<[1], [0], [0], [1], [0, 0, 1, 1], [], []>} : vector<8x2xbf16>, vector<2x128xbf16>, vector<8x128xf32> -> vector<8x128xf32>
    %75 = arith.addf %72, %74 : vector<8x128xf32>
    %76 = vector.broadcast %65 : vector<8x1xf32> to vector<8x128xf32>
    %77 = arith.mulf %76, %75 : vector<8x128xf32>
    %78 = arith.truncf %77 : vector<8x128xf32> to vector<8x128xbf16>
    %cst_42 = arith.constant dense<0.000000e+00> : vector<8x128xf32>
    %79 = tpu.matmul %78, %17, %cst_42 {dimension_numbers = #tpu.dot_dimension_numbers<[1], [0], [0], [1], [0, 0, 1, 1], [], []>} : vector<8x128xbf16>, vector<128x128xbf16>, vector<8x128xf32> -> vector<8x128xf32>
    %80 = arith.addf %79, %19 : vector<8x128xf32>
    %81 = math.tanh %80 : vector<8x128xf32>
    %cst_43 = arith.constant 3.000000e-01 : f32
    %82 = vector.broadcast %cst_43 : f32 to vector<8x128xf32>
    %83 = arith.mulf %82, %81 : vector<8x128xf32>
    %84 = arith.addf %52, %83 : vector<8x128xf32>
    %c1 = arith.constant 1 : index
    %c0_44 = arith.constant 0 : index
    %c0_45 = arith.constant 0 : index
    %85 = vector.load %arg2[%c1, %c0_44, %c0_45] : memref<4x2x128xbf16, #tpu.memory_space<vmem>>, vector<1x2x128xbf16>
    %86 = vector.shape_cast %85 : vector<1x2x128xbf16> to vector<2x128xbf16>
    %c1_46 = arith.constant 1 : index
    %c0_47 = arith.constant 0 : index
    %c0_48 = arith.constant 0 : index
    %87 = vector.load %arg3[%c1_46, %c0_47, %c0_48] : memref<4x2x128xf32, #tpu.memory_space<vmem>>, vector<1x2x128xf32>
    %88 = vector.shape_cast %87 : vector<1x2x128xf32> to vector<2x128xf32>
    %c1_49 = arith.constant 1 : index
    %c0_50 = arith.constant 0 : index
    %c0_51 = arith.constant 0 : index
    %89 = vector.load %arg4[%c1_49, %c0_50, %c0_51] : memref<4x1x2xf32, #tpu.memory_space<vmem>>, vector<1x1x2xf32>
    %90 = vector.shape_cast %89 : vector<1x1x2xf32> to vector<1x2xf32>
    %cst_52 = arith.constant dense<0.000000e+00> : vector<8x2xf32>
    %91 = tpu.matmul %8, %88, %cst_52 {dimension_numbers = #tpu.dot_dimension_numbers<[1], [1], [0], [0], [0, 0, 1, 0], [], []>} : vector<8x128xf32>, vector<2x128xf32>, vector<8x2xf32> -> vector<8x2xf32>
    %cst_53 = arith.constant 0.000000e+00 : f32
    %92 = vector.broadcast %cst_53 : f32 to vector<8x2xf32>
    %93 = arith.maximumf %91, %92 : vector<8x2xf32>
    %cst_54 = arith.constant dense<0.000000e+00> : vector<8xf32>
    %94 = vector.multi_reduction <add>, %93, %cst_54 [1] : vector<8x2xf32> to vector<8xf32>
    %95 = vector.shape_cast %94 : vector<8xf32> to vector<8x1xf32>
    %96 = arith.addf %15, %95 : vector<8x1xf32>
    %97 = math.rsqrt %96 : vector<8x1xf32>
    %98 = vector.broadcast %90 : vector<1x2xf32> to vector<8x2xf32>
    %99 = arith.addf %93, %98 : vector<8x2xf32>
    %100 = math.rsqrt %99 : vector<8x2xf32>
    %101 = arith.mulf %93, %100 : vector<8x2xf32>
    %102 = arith.mulf %15, %97 : vector<8x1xf32>
    %103 = vector.broadcast %102 : vector<8x1xf32> to vector<8x128xf32>
    %104 = arith.mulf %103, %0 : vector<8x128xf32>
    %105 = arith.truncf %101 : vector<8x2xf32> to vector<8x2xbf16>
    %cst_55 = arith.constant dense<0.000000e+00> : vector<8x128xf32>
    %106 = tpu.matmul %105, %86, %cst_55 {dimension_numbers = #tpu.dot_dimension_numbers<[1], [0], [0], [1], [0, 0, 1, 1], [], []>} : vector<8x2xbf16>, vector<2x128xbf16>, vector<8x128xf32> -> vector<8x128xf32>
    %107 = arith.addf %104, %106 : vector<8x128xf32>
    %108 = vector.broadcast %97 : vector<8x1xf32> to vector<8x128xf32>
    %109 = arith.mulf %108, %107 : vector<8x128xf32>
    %110 = arith.truncf %109 : vector<8x128xf32> to vector<8x128xbf16>
    %cst_56 = arith.constant dense<0.000000e+00> : vector<8x128xf32>
    %111 = tpu.matmul %110, %16, %cst_56 {dimension_numbers = #tpu.dot_dimension_numbers<[1], [0], [0], [1], [0, 0, 1, 1], [], []>} : vector<8x128xbf16>, vector<128x128xbf16>, vector<8x128xf32> -> vector<8x128xf32>
    %112 = arith.addf %111, %18 : vector<8x128xf32>
    %113 = math.tanh %112 : vector<8x128xf32>
    %cst_57 = arith.constant 0.699999988 : f32
    %114 = vector.broadcast %cst_57 : f32 to vector<8x128xf32>
    %115 = arith.mulf %114, %113 : vector<8x128xf32>
    %116 = arith.addf %84, %115 : vector<8x128xf32>
    %c1_58 = arith.constant 1 : index
    %c0_59 = arith.constant 0 : index
    %c0_60 = arith.constant 0 : index
    %117 = vector.load %arg5[%c1_58, %c0_59, %c0_60] : memref<4x2x128xbf16, #tpu.memory_space<vmem>>, vector<1x2x128xbf16>
    %118 = vector.shape_cast %117 : vector<1x2x128xbf16> to vector<2x128xbf16>
    %c1_61 = arith.constant 1 : index
    %c0_62 = arith.constant 0 : index
    %c0_63 = arith.constant 0 : index
    %119 = vector.load %arg6[%c1_61, %c0_62, %c0_63] : memref<4x2x128xf32, #tpu.memory_space<vmem>>, vector<1x2x128xf32>
    %120 = vector.shape_cast %119 : vector<1x2x128xf32> to vector<2x128xf32>
    %c1_64 = arith.constant 1 : index
    %c0_65 = arith.constant 0 : index
    %c0_66 = arith.constant 0 : index
    %121 = vector.load %arg7[%c1_64, %c0_65, %c0_66] : memref<4x1x2xf32, #tpu.memory_space<vmem>>, vector<1x1x2xf32>
    %122 = vector.shape_cast %121 : vector<1x1x2xf32> to vector<1x2xf32>
    %cst_67 = arith.constant dense<0.000000e+00> : vector<8x2xf32>
    %123 = tpu.matmul %8, %120, %cst_67 {dimension_numbers = #tpu.dot_dimension_numbers<[1], [1], [0], [0], [0, 0, 1, 0], [], []>} : vector<8x128xf32>, vector<2x128xf32>, vector<8x2xf32> -> vector<8x2xf32>
    %cst_68 = arith.constant 0.000000e+00 : f32
    %124 = vector.broadcast %cst_68 : f32 to vector<8x2xf32>
    %125 = arith.maximumf %123, %124 : vector<8x2xf32>
    %cst_69 = arith.constant dense<0.000000e+00> : vector<8xf32>
    %126 = vector.multi_reduction <add>, %125, %cst_69 [1] : vector<8x2xf32> to vector<8xf32>
    %127 = vector.shape_cast %126 : vector<8xf32> to vector<8x1xf32>
    %128 = arith.addf %15, %127 : vector<8x1xf32>
    %129 = math.rsqrt %128 : vector<8x1xf32>
    %130 = vector.broadcast %122 : vector<1x2xf32> to vector<8x2xf32>
    %131 = arith.addf %125, %130 : vector<8x2xf32>
    %132 = math.rsqrt %131 : vector<8x2xf32>
    %133 = arith.mulf %125, %132 : vector<8x2xf32>
    %134 = arith.mulf %15, %129 : vector<8x1xf32>
    %135 = vector.broadcast %134 : vector<8x1xf32> to vector<8x128xf32>
    %136 = arith.mulf %135, %0 : vector<8x128xf32>
    %137 = arith.truncf %133 : vector<8x2xf32> to vector<8x2xbf16>
    %cst_70 = arith.constant dense<0.000000e+00> : vector<8x128xf32>
    %138 = tpu.matmul %137, %118, %cst_70 {dimension_numbers = #tpu.dot_dimension_numbers<[1], [0], [0], [1], [0, 0, 1, 1], [], []>} : vector<8x2xbf16>, vector<2x128xbf16>, vector<8x128xf32> -> vector<8x128xf32>
    %139 = arith.addf %136, %138 : vector<8x128xf32>
    %140 = vector.broadcast %129 : vector<8x1xf32> to vector<8x128xf32>
    %141 = arith.mulf %140, %139 : vector<8x128xf32>
    %142 = arith.truncf %141 : vector<8x128xf32> to vector<8x128xbf16>
    %cst_71 = arith.constant dense<0.000000e+00> : vector<8x128xf32>
    %143 = tpu.matmul %142, %17, %cst_71 {dimension_numbers = #tpu.dot_dimension_numbers<[1], [0], [0], [1], [0, 0, 1, 1], [], []>} : vector<8x128xbf16>, vector<128x128xbf16>, vector<8x128xf32> -> vector<8x128xf32>
    %144 = arith.addf %143, %19 : vector<8x128xf32>
    %145 = math.tanh %144 : vector<8x128xf32>
    %cst_72 = arith.constant 3.000000e-01 : f32
    %146 = vector.broadcast %cst_72 : f32 to vector<8x128xf32>
    %147 = arith.mulf %146, %145 : vector<8x128xf32>
    %148 = arith.addf %116, %147 : vector<8x128xf32>
    %c2 = arith.constant 2 : index
    %c0_73 = arith.constant 0 : index
    %c0_74 = arith.constant 0 : index
    %149 = vector.load %arg2[%c2, %c0_73, %c0_74] : memref<4x2x128xbf16, #tpu.memory_space<vmem>>, vector<1x2x128xbf16>
    %150 = vector.shape_cast %149 : vector<1x2x128xbf16> to vector<2x128xbf16>
    %c2_75 = arith.constant 2 : index
    %c0_76 = arith.constant 0 : index
    %c0_77 = arith.constant 0 : index
    %151 = vector.load %arg3[%c2_75, %c0_76, %c0_77] : memref<4x2x128xf32, #tpu.memory_space<vmem>>, vector<1x2x128xf32>
    %152 = vector.shape_cast %151 : vector<1x2x128xf32> to vector<2x128xf32>
    %c2_78 = arith.constant 2 : index
    %c0_79 = arith.constant 0 : index
    %c0_80 = arith.constant 0 : index
    %153 = vector.load %arg4[%c2_78, %c0_79, %c0_80] : memref<4x1x2xf32, #tpu.memory_space<vmem>>, vector<1x1x2xf32>
    %154 = vector.shape_cast %153 : vector<1x1x2xf32> to vector<1x2xf32>
    %cst_81 = arith.constant dense<0.000000e+00> : vector<8x2xf32>
    %155 = tpu.matmul %8, %152, %cst_81 {dimension_numbers = #tpu.dot_dimension_numbers<[1], [1], [0], [0], [0, 0, 1, 0], [], []>} : vector<8x128xf32>, vector<2x128xf32>, vector<8x2xf32> -> vector<8x2xf32>
    %cst_82 = arith.constant 0.000000e+00 : f32
    %156 = vector.broadcast %cst_82 : f32 to vector<8x2xf32>
    %157 = arith.maximumf %155, %156 : vector<8x2xf32>
    %cst_83 = arith.constant dense<0.000000e+00> : vector<8xf32>
    %158 = vector.multi_reduction <add>, %157, %cst_83 [1] : vector<8x2xf32> to vector<8xf32>
    %159 = vector.shape_cast %158 : vector<8xf32> to vector<8x1xf32>
    %160 = arith.addf %15, %159 : vector<8x1xf32>
    %161 = math.rsqrt %160 : vector<8x1xf32>
    %162 = vector.broadcast %154 : vector<1x2xf32> to vector<8x2xf32>
    %163 = arith.addf %157, %162 : vector<8x2xf32>
    %164 = math.rsqrt %163 : vector<8x2xf32>
    %165 = arith.mulf %157, %164 : vector<8x2xf32>
    %166 = arith.mulf %15, %161 : vector<8x1xf32>
    %167 = vector.broadcast %166 : vector<8x1xf32> to vector<8x128xf32>
    %168 = arith.mulf %167, %0 : vector<8x128xf32>
    %169 = arith.truncf %165 : vector<8x2xf32> to vector<8x2xbf16>
    %cst_84 = arith.constant dense<0.000000e+00> : vector<8x128xf32>
    %170 = tpu.matmul %169, %150, %cst_84 {dimension_numbers = #tpu.dot_dimension_numbers<[1], [0], [0], [1], [0, 0, 1, 1], [], []>} : vector<8x2xbf16>, vector<2x128xbf16>, vector<8x128xf32> -> vector<8x128xf32>
    %171 = arith.addf %168, %170 : vector<8x128xf32>
    %172 = vector.broadcast %161 : vector<8x1xf32> to vector<8x128xf32>
    %173 = arith.mulf %172, %171 : vector<8x128xf32>
    %174 = arith.truncf %173 : vector<8x128xf32> to vector<8x128xbf16>
    %cst_85 = arith.constant dense<0.000000e+00> : vector<8x128xf32>
    %175 = tpu.matmul %174, %16, %cst_85 {dimension_numbers = #tpu.dot_dimension_numbers<[1], [0], [0], [1], [0, 0, 1, 1], [], []>} : vector<8x128xbf16>, vector<128x128xbf16>, vector<8x128xf32> -> vector<8x128xf32>
    %176 = arith.addf %175, %18 : vector<8x128xf32>
    %177 = math.tanh %176 : vector<8x128xf32>
    %cst_86 = arith.constant 0.699999988 : f32
    %178 = vector.broadcast %cst_86 : f32 to vector<8x128xf32>
    %179 = arith.mulf %178, %177 : vector<8x128xf32>
    %180 = arith.addf %148, %179 : vector<8x128xf32>
    %c2_87 = arith.constant 2 : index
    %c0_88 = arith.constant 0 : index
    %c0_89 = arith.constant 0 : index
    %181 = vector.load %arg5[%c2_87, %c0_88, %c0_89] : memref<4x2x128xbf16, #tpu.memory_space<vmem>>, vector<1x2x128xbf16>
    %182 = vector.shape_cast %181 : vector<1x2x128xbf16> to vector<2x128xbf16>
    %c2_90 = arith.constant 2 : index
    %c0_91 = arith.constant 0 : index
    %c0_92 = arith.constant 0 : index
    %183 = vector.load %arg6[%c2_90, %c0_91, %c0_92] : memref<4x2x128xf32, #tpu.memory_space<vmem>>, vector<1x2x128xf32>
    %184 = vector.shape_cast %183 : vector<1x2x128xf32> to vector<2x128xf32>
    %c2_93 = arith.constant 2 : index
    %c0_94 = arith.constant 0 : index
    %c0_95 = arith.constant 0 : index
    %185 = vector.load %arg7[%c2_93, %c0_94, %c0_95] : memref<4x1x2xf32, #tpu.memory_space<vmem>>, vector<1x1x2xf32>
    %186 = vector.shape_cast %185 : vector<1x1x2xf32> to vector<1x2xf32>
    %cst_96 = arith.constant dense<0.000000e+00> : vector<8x2xf32>
    %187 = tpu.matmul %8, %184, %cst_96 {dimension_numbers = #tpu.dot_dimension_numbers<[1], [1], [0], [0], [0, 0, 1, 0], [], []>} : vector<8x128xf32>, vector<2x128xf32>, vector<8x2xf32> -> vector<8x2xf32>
    %cst_97 = arith.constant 0.000000e+00 : f32
    %188 = vector.broadcast %cst_97 : f32 to vector<8x2xf32>
    %189 = arith.maximumf %187, %188 : vector<8x2xf32>
    %cst_98 = arith.constant dense<0.000000e+00> : vector<8xf32>
    %190 = vector.multi_reduction <add>, %189, %cst_98 [1] : vector<8x2xf32> to vector<8xf32>
    %191 = vector.shape_cast %190 : vector<8xf32> to vector<8x1xf32>
    %192 = arith.addf %15, %191 : vector<8x1xf32>
    %193 = math.rsqrt %192 : vector<8x1xf32>
    %194 = vector.broadcast %186 : vector<1x2xf32> to vector<8x2xf32>
    %195 = arith.addf %189, %194 : vector<8x2xf32>
    %196 = math.rsqrt %195 : vector<8x2xf32>
    %197 = arith.mulf %189, %196 : vector<8x2xf32>
    %198 = arith.mulf %15, %193 : vector<8x1xf32>
    %199 = vector.broadcast %198 : vector<8x1xf32> to vector<8x128xf32>
    %200 = arith.mulf %199, %0 : vector<8x128xf32>
    %201 = arith.truncf %197 : vector<8x2xf32> to vector<8x2xbf16>
    %cst_99 = arith.constant dense<0.000000e+00> : vector<8x128xf32>
    %202 = tpu.matmul %201, %182, %cst_99 {dimension_numbers = #tpu.dot_dimension_numbers<[1], [0], [0], [1], [0, 0, 1, 1], [], []>} : vector<8x2xbf16>, vector<2x128xbf16>, vector<8x128xf32> -> vector<8x128xf32>
    %203 = arith.addf %200, %202 : vector<8x128xf32>
    %204 = vector.broadcast %193 : vector<8x1xf32> to vector<8x128xf32>
    %205 = arith.mulf %204, %203 : vector<8x128xf32>
    %206 = arith.truncf %205 : vector<8x128xf32> to vector<8x128xbf16>
    %cst_100 = arith.constant dense<0.000000e+00> : vector<8x128xf32>
    %207 = tpu.matmul %206, %17, %cst_100 {dimension_numbers = #tpu.dot_dimension_numbers<[1], [0], [0], [1], [0, 0, 1, 1], [], []>} : vector<8x128xbf16>, vector<128x128xbf16>, vector<8x128xf32> -> vector<8x128xf32>
    %208 = arith.addf %207, %19 : vector<8x128xf32>
    %209 = math.tanh %208 : vector<8x128xf32>
    %cst_101 = arith.constant 3.000000e-01 : f32
    %210 = vector.broadcast %cst_101 : f32 to vector<8x128xf32>
    %211 = arith.mulf %210, %209 : vector<8x128xf32>
    %212 = arith.addf %180, %211 : vector<8x128xf32>
    %c3 = arith.constant 3 : index
    %c0_102 = arith.constant 0 : index
    %c0_103 = arith.constant 0 : index
    %213 = vector.load %arg2[%c3, %c0_102, %c0_103] : memref<4x2x128xbf16, #tpu.memory_space<vmem>>, vector<1x2x128xbf16>
    %214 = vector.shape_cast %213 : vector<1x2x128xbf16> to vector<2x128xbf16>
    %c3_104 = arith.constant 3 : index
    %c0_105 = arith.constant 0 : index
    %c0_106 = arith.constant 0 : index
    %215 = vector.load %arg3[%c3_104, %c0_105, %c0_106] : memref<4x2x128xf32, #tpu.memory_space<vmem>>, vector<1x2x128xf32>
    %216 = vector.shape_cast %215 : vector<1x2x128xf32> to vector<2x128xf32>
    %c3_107 = arith.constant 3 : index
    %c0_108 = arith.constant 0 : index
    %c0_109 = arith.constant 0 : index
    %217 = vector.load %arg4[%c3_107, %c0_108, %c0_109] : memref<4x1x2xf32, #tpu.memory_space<vmem>>, vector<1x1x2xf32>
    %218 = vector.shape_cast %217 : vector<1x1x2xf32> to vector<1x2xf32>
    %cst_110 = arith.constant dense<0.000000e+00> : vector<8x2xf32>
    %219 = tpu.matmul %8, %216, %cst_110 {dimension_numbers = #tpu.dot_dimension_numbers<[1], [1], [0], [0], [0, 0, 1, 0], [], []>} : vector<8x128xf32>, vector<2x128xf32>, vector<8x2xf32> -> vector<8x2xf32>
    %cst_111 = arith.constant 0.000000e+00 : f32
    %220 = vector.broadcast %cst_111 : f32 to vector<8x2xf32>
    %221 = arith.maximumf %219, %220 : vector<8x2xf32>
    %cst_112 = arith.constant dense<0.000000e+00> : vector<8xf32>
    %222 = vector.multi_reduction <add>, %221, %cst_112 [1] : vector<8x2xf32> to vector<8xf32>
    %223 = vector.shape_cast %222 : vector<8xf32> to vector<8x1xf32>
    %224 = arith.addf %15, %223 : vector<8x1xf32>
    %225 = math.rsqrt %224 : vector<8x1xf32>
    %226 = vector.broadcast %218 : vector<1x2xf32> to vector<8x2xf32>
    %227 = arith.addf %221, %226 : vector<8x2xf32>
    %228 = math.rsqrt %227 : vector<8x2xf32>
    %229 = arith.mulf %221, %228 : vector<8x2xf32>
    %230 = arith.mulf %15, %225 : vector<8x1xf32>
    %231 = vector.broadcast %230 : vector<8x1xf32> to vector<8x128xf32>
    %232 = arith.mulf %231, %0 : vector<8x128xf32>
    %233 = arith.truncf %229 : vector<8x2xf32> to vector<8x2xbf16>
    %cst_113 = arith.constant dense<0.000000e+00> : vector<8x128xf32>
    %234 = tpu.matmul %233, %214, %cst_113 {dimension_numbers = #tpu.dot_dimension_numbers<[1], [0], [0], [1], [0, 0, 1, 1], [], []>} : vector<8x2xbf16>, vector<2x128xbf16>, vector<8x128xf32> -> vector<8x128xf32>
    %235 = arith.addf %232, %234 : vector<8x128xf32>
    %236 = vector.broadcast %225 : vector<8x1xf32> to vector<8x128xf32>
    %237 = arith.mulf %236, %235 : vector<8x128xf32>
    %238 = arith.truncf %237 : vector<8x128xf32> to vector<8x128xbf16>
    %cst_114 = arith.constant dense<0.000000e+00> : vector<8x128xf32>
    %239 = tpu.matmul %238, %16, %cst_114 {dimension_numbers = #tpu.dot_dimension_numbers<[1], [0], [0], [1], [0, 0, 1, 1], [], []>} : vector<8x128xbf16>, vector<128x128xbf16>, vector<8x128xf32> -> vector<8x128xf32>
    %240 = arith.addf %239, %18 : vector<8x128xf32>
    %241 = math.tanh %240 : vector<8x128xf32>
    %cst_115 = arith.constant 0.699999988 : f32
    %242 = vector.broadcast %cst_115 : f32 to vector<8x128xf32>
    %243 = arith.mulf %242, %241 : vector<8x128xf32>
    %244 = arith.addf %212, %243 : vector<8x128xf32>
    %c3_116 = arith.constant 3 : index
    %c0_117 = arith.constant 0 : index
    %c0_118 = arith.constant 0 : index
    %245 = vector.load %arg5[%c3_116, %c0_117, %c0_118] : memref<4x2x128xbf16, #tpu.memory_space<vmem>>, vector<1x2x128xbf16>
    %246 = vector.shape_cast %245 : vector<1x2x128xbf16> to vector<2x128xbf16>
    %c3_119 = arith.constant 3 : index
    %c0_120 = arith.constant 0 : index
    %c0_121 = arith.constant 0 : index
    %247 = vector.load %arg6[%c3_119, %c0_120, %c0_121] : memref<4x2x128xf32, #tpu.memory_space<vmem>>, vector<1x2x128xf32>
    %248 = vector.shape_cast %247 : vector<1x2x128xf32> to vector<2x128xf32>
    %c3_122 = arith.constant 3 : index
    %c0_123 = arith.constant 0 : index
    %c0_124 = arith.constant 0 : index
    %249 = vector.load %arg7[%c3_122, %c0_123, %c0_124] : memref<4x1x2xf32, #tpu.memory_space<vmem>>, vector<1x1x2xf32>
    %250 = vector.shape_cast %249 : vector<1x1x2xf32> to vector<1x2xf32>
    %cst_125 = arith.constant dense<0.000000e+00> : vector<8x2xf32>
    %251 = tpu.matmul %8, %248, %cst_125 {dimension_numbers = #tpu.dot_dimension_numbers<[1], [1], [0], [0], [0, 0, 1, 0], [], []>} : vector<8x128xf32>, vector<2x128xf32>, vector<8x2xf32> -> vector<8x2xf32>
    %cst_126 = arith.constant 0.000000e+00 : f32
    %252 = vector.broadcast %cst_126 : f32 to vector<8x2xf32>
    %253 = arith.maximumf %251, %252 : vector<8x2xf32>
    %cst_127 = arith.constant dense<0.000000e+00> : vector<8xf32>
    %254 = vector.multi_reduction <add>, %253, %cst_127 [1] : vector<8x2xf32> to vector<8xf32>
    %255 = vector.shape_cast %254 : vector<8xf32> to vector<8x1xf32>
    %256 = arith.addf %15, %255 : vector<8x1xf32>
    %257 = math.rsqrt %256 : vector<8x1xf32>
    %258 = vector.broadcast %250 : vector<1x2xf32> to vector<8x2xf32>
    %259 = arith.addf %253, %258 : vector<8x2xf32>
    %260 = math.rsqrt %259 : vector<8x2xf32>
    %261 = arith.mulf %253, %260 : vector<8x2xf32>
    %262 = arith.mulf %15, %257 : vector<8x1xf32>
    %263 = vector.broadcast %262 : vector<8x1xf32> to vector<8x128xf32>
    %264 = arith.mulf %263, %0 : vector<8x128xf32>
    %265 = arith.truncf %261 : vector<8x2xf32> to vector<8x2xbf16>
    %cst_128 = arith.constant dense<0.000000e+00> : vector<8x128xf32>
    %266 = tpu.matmul %265, %246, %cst_128 {dimension_numbers = #tpu.dot_dimension_numbers<[1], [0], [0], [1], [0, 0, 1, 1], [], []>} : vector<8x2xbf16>, vector<2x128xbf16>, vector<8x128xf32> -> vector<8x128xf32>
    %267 = arith.addf %264, %266 : vector<8x128xf32>
    %268 = vector.broadcast %257 : vector<8x1xf32> to vector<8x128xf32>
    %269 = arith.mulf %268, %267 : vector<8x128xf32>
    %270 = arith.truncf %269 : vector<8x128xf32> to vector<8x128xbf16>
    %cst_129 = arith.constant dense<0.000000e+00> : vector<8x128xf32>
    %271 = tpu.matmul %270, %17, %cst_129 {dimension_numbers = #tpu.dot_dimension_numbers<[1], [0], [0], [1], [0, 0, 1, 1], [], []>} : vector<8x128xbf16>, vector<128x128xbf16>, vector<8x128xf32> -> vector<8x128xf32>
    %272 = arith.addf %271, %19 : vector<8x128xf32>
    %273 = math.tanh %272 : vector<8x128xf32>
    %cst_130 = arith.constant 3.000000e-01 : f32
    %274 = vector.broadcast %cst_130 : f32 to vector<8x128xf32>
    %275 = arith.mulf %274, %273 : vector<8x128xf32>
    %276 = arith.addf %244, %275 : vector<8x128xf32>
    %cst_131 = arith.constant 2.500000e-01 : f32
    %277 = vector.broadcast %cst_131 : f32 to vector<8x128xf32>
    %278 = arith.mulf %276, %277 : vector<8x128xf32>
    %cst_132 = arith.constant 5.000000e-01 : f32
    %279 = vector.broadcast %cst_132 : f32 to vector<8x128xf32>
    %280 = arith.mulf %279, %0 : vector<8x128xf32>
    %cst_133 = arith.constant 5.000000e-01 : f32
    %281 = vector.broadcast %cst_133 : f32 to vector<8x128xf32>
    %282 = arith.mulf %281, %278 : vector<8x128xf32>
    %283 = arith.addf %280, %282 : vector<8x128xf32>
    %284 = arith.mulf %283, %283 : vector<8x128xf32>
    %cst_134 = arith.constant dense<0.000000e+00> : vector<8xf32>
    %285 = vector.multi_reduction <add>, %284, %cst_134 [1] : vector<8x128xf32> to vector<8xf32>
    %286 = vector.shape_cast %285 : vector<8xf32> to vector<8x1xf32>
    %cst_135 = arith.constant 1.000000e-24 : f32
    %287 = vector.broadcast %cst_135 : f32 to vector<8x1xf32>
    %288 = arith.maximumf %286, %287 : vector<8x1xf32>
    %289 = math.rsqrt %288 : vector<8x1xf32>
    %290 = vector.broadcast %289 : vector<8x1xf32> to vector<8x128xf32>
    %291 = arith.mulf %283, %290 : vector<8x128xf32>
    %c0_136 = arith.constant 0 : index
    %c0_137 = arith.constant 0 : index
    %292 = vector.load %arg12[%c0_136, %c0_137] : memref<8x128xf32, #tpu.memory_space<vmem>>, vector<8x128xf32>
    tpu.vector_store %arg12[%c0_136, %c0_137], %291 {strides = array<i32>} : memref<8x128xf32, #tpu.memory_space<vmem>>, vector<8x128xf32>,
    return
  }
  func.func @transform_0(%arg0: i32) -> (i32, i32) {
    %c0_i32 = arith.constant 0 : i32
    %c0_i32_0 = arith.constant 0 : i32
    return %arg0, %c0_i32 : i32, i32
  }
  func.func @transform_1(%arg0: i32) -> (i32, i32, i32) {
    %c0_i32 = arith.constant 0 : i32
    %c0_i32_0 = arith.constant 0 : i32
    %c0_i32_1 = arith.constant 0 : i32
    %c0_i32_2 = arith.constant 0 : i32
    return %c0_i32, %c0_i32_0, %c0_i32_1 : i32, i32, i32
  }
  func.func @transform_2(%arg0: i32) -> (i32, i32, i32) {
    %c0_i32 = arith.constant 0 : i32
    %c0_i32_0 = arith.constant 0 : i32
    %c0_i32_1 = arith.constant 0 : i32
    %c0_i32_2 = arith.constant 0 : i32
    return %c0_i32, %c0_i32_0, %c0_i32_1 : i32, i32, i32
  }
  func.func @transform_3(%arg0: i32) -> (i32, i32, i32) {
    %c0_i32 = arith.constant 0 : i32
    %c0_i32_0 = arith.constant 0 : i32
    %c0_i32_1 = arith.constant 0 : i32
    %c0_i32_2 = arith.constant 0 : i32
    return %c0_i32, %c0_i32_0, %c0_i32_1 : i32, i32, i32
  }
  func.func @transform_4(%arg0: i32) -> (i32, i32, i32) {
    %c0_i32 = arith.constant 0 : i32
    %c0_i32_0 = arith.constant 0 : i32
    %c0_i32_1 = arith.constant 0 : i32
    %c0_i32_2 = arith.constant 0 : i32
    return %c0_i32, %c0_i32_0, %c0_i32_1 : i32, i32, i32
  }
  func.func @transform_5(%arg0: i32) -> (i32, i32, i32) {
    %c0_i32 = arith.constant 0 : i32
    %c0_i32_0 = arith.constant 0 : i32
    %c0_i32_1 = arith.constant 0 : i32
    %c0_i32_2 = arith.constant 0 : i32
    return %c0_i32, %c0_i32_0, %c0_i32_1 : i32, i32, i32
  }
  func.func @transform_6(%arg0: i32) -> (i32, i32, i32) {
    %c0_i32 = arith.constant 0 : i32
    %c0_i32_0 = arith.constant 0 : i32
    %c0_i32_1 = arith.constant 0 : i32
    %c0_i32_2 = arith.constant 0 : i32
    return %c0_i32, %c0_i32_0, %c0_i32_1 : i32, i32, i32
  }
  func.func @transform_7(%arg0: i32) -> (i32, i32) {
    %c0_i32 = arith.constant 0 : i32
    %c0_i32_0 = arith.constant 0 : i32
    %c0_i32_1 = arith.constant 0 : i32
    return %c0_i32, %c0_i32_0 : i32, i32
  }
  func.func @transform_8(%arg0: i32) -> (i32, i32) {
    %c0_i32 = arith.constant 0 : i32
    %c0_i32_0 = arith.constant 0 : i32
    return %arg0, %c0_i32 : i32, i32
  }
  func.func @transform_9(%arg0: i32) -> (i32, i32) {
    %c0_i32 = arith.constant 0 : i32
    %c0_i32_0 = arith.constant 0 : i32
    %c0_i32_1 = arith.constant 0 : i32
    return %c0_i32, %c0_i32_0 : i32, i32
  }
  func.func @transform_10(%arg0: i32) -> (i32, i32) {
    %c0_i32 = arith.constant 0 : i32
    %c0_i32_0 = arith.constant 0 : i32
    return %arg0, %c0_i32 : i32, i32
  }
  func.func @transform_11(%arg0: i32) -> (i32, i32) {
    %c0_i32 = arith.constant 0 : i32
    %c0_i32_0 = arith.constant 0 : i32
    return %arg0, %c0_i32 : i32, i32
  }
}

</mosaic_0001>

<bundles_post_ra>
// kernel: tpu_custom_call.1
= control target key start
LH: loop header
LB: loop body
LE: loop exit
PB: predicated region body
PF: predicated region fallthrough
CT: control target
= control target key end

     0   :  { %16 = vsyncpa [#allocation3], 0  ;;  %s2851_s0 = inlined_call_operand.vmem [shape: f32[8,128], index: 0, kind: input, shape index: {}]   ;;  %s2852_s1 = inlined_call_operand.hbm [shape: bf16[4,2,128], index: 1, kind: input, shape index: {}]   ;;  %s2853_s2 = inlined_call_operand.vmem [shape: f32[4,2,128], index: 2, kind: input, shape index: {}]   ;;  %s2854_s3 = inlined_call_operand.vmem [shape: f32[4,1,2], index: 3, kind: input, shape index: {}]   ;;  %s2855_s4 = inlined_call_operand.hbm [shape: bf16[4,2,128], index: 4, kind: input, shape index: {}]   ;;  %s2856_s5 = inlined_call_operand.vmem [shape: f32[4,2,128], index: 5, kind: input, shape index: {}]   ;;  %s2857_s6 = inlined_call_operand.vmem [shape: f32[4,1,2], index: 6, kind: input, shape index: {}]   ;;  %s2858_s7 = inlined_call_operand.hbm [shape: bf16[128,128], index: 7, kind: input, shape index: {}]   ;;  %s2859_s8 = inlined_call_operand.vmem [shape: f32[8,128], index: 8, kind: input, shape index: {}]   ;;  %s2860_s9 = inlined_call_operand.hbm [shape: bf16[128,128], index: 9, kind: input, shape index: {}]   ;;  %s2861_s10 = inlined_call_operand.vmem [shape: f32[8,128], index: 10, kind: input, shape index: {}]   ;;  %s2862_s11 = inlined_call_operand.hbm [shape: f32[8,128], index: 11, kind: output, shape index: {}]  }
   0x1   :  { %17 = vsyncpa [#allocation6], 0 }
   0x2   :  { %18 = vsyncpa [#allocation9], 0 }
   0x3   :  { %19 = vsyncpa [#allocation4], 0  ;;  %s2343_s17 = smov [#allocation5]   ;;  %s2344_s19 = smov [#allocation2]  }
   0x4   :  { %s43_s18 = sshll.u32 %s2343_s17, 4  ;;  %s27_s20 = sshll.u32 %s2344_s19, 4  ;;  %s44_s18 = int_to_ptr.vmem [resolvable:$true] %s43_s18  ;;  %s2414_s20 = int_to_ptr.vmem [resolvable:$true] %s27_s20 }
   0x5   :  { %s2225_s23 = scalar_lea.hbm %s2855_s4, 64 }
   0x6   :  { %p2226_p0 = scmp.ne.s32.totalorder %s2855_s4, %s2225_s23  ;;  %p2229_p1 = scmp.lt.u32.totalorder %s2225_s23, %s2855_s4 }
   0x8   :  { %p2231_p2 = pnand %p2229_p1, %p2226_p0 }
   0xa   :  { %2234 = shalt.err (!%p2231_p2)
}
   0xb   :  { %s2235_s28 = scalar_lea.vmem %s44_s18, 64  ;;  %p2240_p4 = scmp.lt.s32.totalorder %s44_s18, %s44_s18 }
   0xc   :  { %p2236_p3 = scmp.ne.s32.totalorder %s44_s18, %s2235_s28  ;;  %p2241_p5 = scmp.lt.s32.totalorder %s2235_s28, %s2235_s28 }
   0xe   :  { %p2242_p6 = por %p2241_p5, %p2240_p4 }
  0x10   :  { %p2243_p7 = pnand %p2242_p6, %p2236_p3 }
  0x12   :  { %2246 = shalt.err (!%p2243_p7)
}
  0x13   :  { %s2345_s29 = smov 16   ;;  %s2346_s30 = smov 1  }
  0x14   :  { %49 = dma.hbm_to_vmem [thread:$0]  %s2855_s4, 64, %s44_s18, [#allocation6], %s2345_s29, %s2345_s29, %s2346_s30  }
  0x15   :  { %s2247_s16 = scalar_lea.hbm %s2852_s1, 64 }
  0x16   :  { %p2248_p8 = scmp.ne.s32.totalorder %s2852_s1, %s2247_s16  ;;  %p2251_p9 = scmp.lt.u32.totalorder %s2247_s16, %s2852_s1 }
  0x18   :  { %p2253_p10 = pnand %p2251_p9, %p2248_p8 }
  0x1a   :  { %2256 = shalt.err (!%p2253_p10)
}
  0x1b   :  { %s2257_s23 = scalar_lea.vmem %s2414_s20, 64  ;;  %p2262_p12 = scmp.lt.s32.totalorder %s2414_s20, %s2414_s20 }
  0x1c   :  { %p2258_p11 = scmp.ne.s32.totalorder %s2414_s20, %s2257_s23  ;;  %p2263_p13 = scmp.lt.s32.totalorder %s2257_s23, %s2257_s23 }
  0x1e   :  { %p2264_p0 = por %p2263_p13, %p2262_p12 }
  0x20   :  { %p2265_p1 = pnand %p2264_p0, %p2258_p11 }
  0x22   :  { %2268 = shalt.err (!%p2265_p1)
}
  0x23   :  { %33 = dma.hbm_to_vmem [thread:$0]  %s2852_s1, 64, %s2414_s20, [#allocation3], %s2345_s29, %s2345_s29, %s2346_s30  }
  0x24   :  { %s2347_s24 = smov [#allocation7]   ;;  %s2269_s28 = scalar_lea.hbm %s2858_s7, 1024 }
  0x25   :  { %s59_s25 = sshll.u32 %s2347_s24, 4  ;;  %p2270_p2 = scmp.ne.s32.totalorder %s2858_s7, %s2269_s28  ;;  %s60_s25 = int_to_ptr.vmem [resolvable:$true] %s59_s25 }
  0x26   :  { %p2273_p3 = scmp.lt.u32.totalorder %s2269_s28, %s2858_s7 }
  0x28   :  { %p2275_p4 = pnand %p2273_p3, %p2270_p2 }
  0x2a   :  { %2278 = shalt.err (!%p2275_p4)
}
  0x2b   :  { %s2279_s16 = scalar_lea.vmem %s60_s25, 1024  ;;  %p2284_p6 = scmp.lt.s32.totalorder %s60_s25, %s60_s25 }
  0x2c   :  { %p2280_p5 = scmp.ne.s32.totalorder %s60_s25, %s2279_s16  ;;  %p2285_p7 = scmp.lt.s32.totalorder %s2279_s16, %s2279_s16 }
  0x2e   :  { %p2286_p8 = por %p2285_p7, %p2284_p6 }
  0x30   :  { %p2287_p9 = pnand %p2286_p8, %p2280_p5 }
  0x32   :  { %2290 = shalt.err (!%p2287_p9)
}
  0x33   :  { %s2348_s1 = smov 64   ;;  %s2349_s20 = smov 4  }
  0x34   :  { %65 = dma.hbm_to_vmem [thread:$0]  %s2858_s7, 1024, %s60_s25, [#allocation6], %s2348_s1, %s2348_s1, %s2349_s20  }
  0x35   :  { %s2350_s17 = smov [#allocation8]   ;;  %s2291_s23 = scalar_lea.hbm %s2860_s9, 1024 }
  0x36   :  { %s73_s19 = sshll.u32 %s2350_s17, 4  ;;  %p2292_p10 = scmp.ne.s32.totalorder %s2860_s9, %s2291_s23  ;;  %s74_s19 = int_to_ptr.vmem [resolvable:$true] %s73_s19 }
  0x37   :  { %p2295_p11 = scmp.lt.u32.totalorder %s2291_s23, %s2860_s9 }
  0x39   :  { %p2297_p12 = pnand %p2295_p11, %p2292_p10 }
  0x3b   :  { %2300 = shalt.err (!%p2297_p12)
}
  0x3c   :  { %s2301_s27 = scalar_lea.vmem %s74_s19, 1024  ;;  %p2306_p0 = scmp.lt.s32.totalorder %s74_s19, %s74_s19 }
  0x3d   :  { %p2302_p13 = scmp.ne.s32.totalorder %s74_s19, %s2301_s27  ;;  %p2307_p1 = scmp.lt.s32.totalorder %s2301_s27, %s2301_s27 }
  0x3f   :  { %p2308_p2 = por %p2307_p1, %p2306_p0 }
  0x41   :  { %p2309_p3 = pnand %p2308_p2, %p2302_p13 }
  0x43   :  { %2312 = shalt.err (!%p2309_p3)
}
  0x44   :  { %79 = dma.hbm_to_vmem [thread:$0]  %s2860_s9, 1024, %s74_s19, [#allocation9], %s2348_s1, %s2348_s1, %s2349_s20  }
  0x45   :  { %2335 = dma.done.wait [#allocation3], 64  }
  0x46   :  { %2336 = vsyncadd [#allocation3], 4294967232 }
  0x47   :  { %2337 = dma.done.wait [#allocation6], 1088  }
  0x48   :  { %2338 = vsyncadd [#allocation6], 4294966208 }
  0x49   :  { %2339 = dma.done.wait [#allocation9], 1024  }
  0x4a   :  { %2340 = vsyncadd [#allocation9], 4294966272  ;;  %v2472_v0 = vld [vmem:[%s2851_s0] sm:$0xff]  ;;  %v2351_v2 = vmov 0.0   ;;  %vm2352_vm0 = vmmov 0   ;;  %vm236_vm1 = vcmask 1040384  }
  0x4b   :  { %v96_v1 = vmul.f32 %v2472_v0, %v2472_v0  ;;  %1897 = vmatprep.subr.mxu0 %v2351_v2  ;;  %1928 = vmatprep.subr.mxu1 %v2351_v2  ;;  %v142_v3 = vld [vmem:[%s2853_s2] sm:$0x3]  ;;  %v374_v11 = vld [vmem:[#allocation5] sm:$0x1]  ;;  %vm215_vm2 = vcmask 15360   ;;  %v2519_v32 = vld [vmem:[#allocation7] sm:$0xff]  }
  0x4c   :  { %v375_v4 = vld [vmem:[%s2856_s5] sm:$0x3]  ;;  %1898 = vmatpush3.xpose.msra.mxu0 %v142_v3  ;;  %1899 = vmatprep.mubr.msk.f32.mxu0 %vm2352_vm0, %v2351_v2  ;;  %v469_v13 = vsel %vm236_vm1, %v374_v11, 0  ;;  %v2521_v33 = vld [vmem:[#allocation8] sm:$0xff]   ;;  %v2525_v34 = vld [vmem:[#allocation7 + $0x8] sm:$0xff]  }
  0x4d   :  { %97 = vadd.xlane.f32.xlu0 %v96_v1  ;;  %1929 = vmatpush3.xpose.msra.mxu1 %v375_v4  ;;  %v141_v10 = vld [vmem:[#allocation2] sm:$0x1]  ;;  %v2527_v35 = vld [vmem:[#allocation8 + $0x8] sm:$0xff]   ;;  %v2533_v36 = vld [vmem:[#allocation7 + $0x10] sm:$0xff]  }
  0x4e   :  { %1902 = vmatprep.subr.bf16.mxu0 %v2351_v2  ;;  %1933 = vmatprep.subr.bf16.mxu1 %v2351_v2  ;;  %v238_v12 = vsel %vm236_vm1, %v141_v10, 0  ;;  %v1749_v14 = vld [vmem:[%s2854_s3] ss:$0 sm:$0xff]  ;;  %v2535_v37 = vld [vmem:[#allocation8 + $0x10] sm:$0xff]   ;;  %v2549_v40 = vld [vmem:[#allocation7 + $0x20] sm:$0xff]  }
  0x4f   :  { %1930 = vmatprep.mubr.msk.f32.mxu1 %vm2352_vm0, %v2351_v2  ;;  %v1759_v16 = vld [vmem:[%s2857_s6] ss:$0 sm:$0xff]  ;;  %v2551_v41 = vld [vmem:[#allocation8 + $0x20] sm:$0xff]   ;;  %v2557_v42 = vld [vmem:[#allocation7 + $0x28] sm:$0xff]  }
  0x50   :  { %v2541_v38 = vld [vmem:[#allocation7 + $0x18] sm:$0xff]   ;;  %v2559_v43 = vld [vmem:[#allocation8 + $0x28] sm:$0xff]   ;;  %v2565_v44 = vld [vmem:[#allocation7 + $0x30] sm:$0xff]  }
  0x51   :  { %v2543_v39 = vld [vmem:[#allocation8 + $0x18] sm:$0xff]   ;;  %v2567_v45 = vld [vmem:[#allocation8 + $0x30] sm:$0xff]  }
  0x52   :  { %v2573_v46 = vld [vmem:[#allocation7 + $0x38] sm:$0xff]  }
  0x53   :  { %v2579_v47 = vld [vmem:[#allocation8 + $0x38] sm:$0xff]  }
  0xda   :  { %v98_v5 = vpop.xlane.xlu0 %97 }
  0xdb   :  { %v99_v6 = vmax.f32 %v98_v5, 1e-24 }
  0xdd   :  { %2172 = vrsqrt.f32 %v99_v6 }
  0xe7   :  { %v2173_v7 = vpop.eup %2172 }
  0xe8   :  { %v2491_v8 = vmul.f32 %v2173_v7, %v2472_v0 }
  0xea   :  { %1900 = vmatmul.mubr.f32.vlgmr.msra.gmra.mrb[0].mxu0 %v2491_v8  ;;  %1931 = vmatmul.mubr.f32.vlgmr.msra.gmra.mrb[0].mxu1 %v2491_v8  ;;  %v102_v9 = vmul.f32 %v2491_v8, %v2491_v8 }
  0xeb   :  { %1904 = vmatprep.mubr.msk.bf16.mxu0 %vm2352_vm0, %v2351_v2  ;;  %1935 = vmatprep.mubr.msk.bf16.mxu1 %vm2352_vm0, %v2351_v2 }
  0xec   :  { %103 = vadd.xlane.f32.xlu0 %v102_v9  ;;  %1903 = vmatpush3.bf16.msra.mxu0 %v238_v12 }
  0xed   :  { %1934 = vmatpush3.bf16.msra.mxu1 %v469_v13  ;;  %1908 = vmatprep.subr.bf16.mxu0 %v2351_v2  ;;  %v1769_v13 = vld [vmem:[%s2853_s2 + $0x2] sm:$0x3] }
  0xee   :  { %1939 = vmatprep.subr.bf16.mxu1 %v2351_v2 }
 0x179   :  { %v104_v48 = vpop.xlane.xlu0 %103 }
 0x17a   :  { %v105_v50 = vmax.f32 %v104_v48, 0.0  ;;  %v1771_v48 = vld [vmem:[%s2854_s3 + $0x1] ss:$0 sm:$0xff] }
 0x17c   :  { %v2583_v51 = vadd.f32 1.0, %v105_v50 }
 0x1bd   :  { %v210_v15 = vpop.f32.mrb[0].mxu0  ;;  %v443_v17 = vpop.f32.mrb[0].mxu1 }
 0x1be   :  { %v214_v18 = vmax.f32 %v210_v15, 0.0  ;;  %v447_v19 = vmax.f32 %v443_v17, 0.0  ;;  %v1901_v20 = vpop.f32.mrb[1].mxu0  ;;  %v1932_v21 = vpop.f32.mrb[1].mxu1  ;;  %v1773_v15 = vld [vmem:[%s2856_s5 + $0x2] sm:$0x3] }
 0x1bf   :  { %v792_v17 = vld [vmem:[#allocation5 + $0x1] sm:$0x1] }
 0x1c0   :  { %v227_v22 = vadd.f32 %v1749_v14, %v214_v18  ;;  %v459_v23 = vadd.f32 %v1759_v16, %v447_v19  ;;  %v216_v24 = vsel %vm215_vm2, %v214_v18, 0.0  ;;  %v448_v25 = vsel %vm215_vm2, %v447_v19, 0.0  ;;  %v606_v16 = vld [vmem:[#allocation2 + $0x1] sm:$0x1] }
 0x1c1   :  { %217 = vadd.xlane.f32.xlu1 %v216_v24  ;;  %v2616_v20 = vld [vmem:[%s2859_s8] sm:$0xff] }
 0x1c2   :  { %2174 = vrsqrt.f32 %v227_v22  ;;  %v2621_v21 = vld [vmem:[%s2861_s10] sm:$0xff] }
 0x1c3   :  { %2176 = vrsqrt.f32 %v459_v23 }
 0x1c5   :  { %449 = vadd.xlane.f32.xlu1 %v448_v25 }
 0x1cc   :  { %v2175_v26 = vpop.eup %2174 }
 0x1cd   :  { %v2177_v27 = vpop.eup %2176  ;;  %v229_v28 = vmul.f32 %v2175_v26, %v214_v18  ;;  %v703_v18 = vsel %vm236_vm1, %v606_v16, 0 }
 0x1ce   :  { %v461_v29 = vmul.f32 %v2177_v27, %v447_v19  ;;  %v889_v19 = vsel %vm236_vm1, %v792_v17, 0 }
 0x1cf   :  { %v232_v30 = vpack.c.bf16 %v229_v28, %v229_v28 }
 0x1d0   :  { %v464_v31 = vpack.c.bf16 %v461_v29, %v461_v29 }
 0x1d1   :  { %1905 = vmatmul.mubr.msk.bf16.vlgmr.msra.gmra.mrb[4].mxu0 %vm215_vm2, %v232_v30 }
 0x1d2   :  { %1936 = vmatmul.mubr.msk.bf16.vlgmr.msra.gmra.mrb[4].mxu1 %vm215_vm2, %v464_v31  ;;  %1924 = vmatprep.mubr.msk.bf16.mxu0 %vm2352_vm0, %v2351_v2 }
 0x1d3   :  { %1955 = vmatprep.mubr.msk.bf16.mxu1 %vm2352_vm0, %v2351_v2  ;;  %1909 = vmatpush3.bf16.msra.mxu0 %v2519_v32 }
 0x1d4   :  { %1940 = vmatpush3.bf16.msra.mxu1 %v2521_v33  ;;  %1910 = vmatprep.subr.bf16.mxu0 %v2351_v2 }
 0x1d5   :  { %1941 = vmatprep.subr.bf16.mxu1 %v2351_v2 }
 0x1d7   :  { %1911 = vmatpush3.bf16.msra.mxu0 %v2525_v34 }
 0x1d8   :  { %1942 = vmatpush3.bf16.msra.mxu1 %v2527_v35  ;;  %1912 = vmatprep.subr.bf16.mxu0 %v2351_v2 }
 0x1d9   :  { %1943 = vmatprep.subr.bf16.mxu1 %v2351_v2 }
 0x1db   :  { %1913 = vmatpush3.bf16.msra.mxu0 %v2533_v36 }
 0x1dc   :  { %1944 = vmatpush3.bf16.msra.mxu1 %v2535_v37  ;;  %1914 = vmatprep.subr.bf16.mxu0 %v2351_v2 }
 0x1dd   :  { %1945 = vmatprep.subr.bf16.mxu1 %v2351_v2 }
 0x1df   :  { %1915 = vmatpush3.bf16.msra.mxu0 %v2541_v38 }
 0x1e0   :  { %1946 = vmatpush3.bf16.msra.mxu1 %v2543_v39  ;;  %1916 = vmatprep.subr.bf16.mxu0 %v2351_v2 }
 0x1e1   :  { %1947 = vmatprep.subr.bf16.mxu1 %v2351_v2 }
 0x1e3   :  { %1917 = vmatpush3.bf16.msra.mxu0 %v2549_v40 }
 0x1e4   :  { %1948 = vmatpush3.bf16.msra.mxu1 %v2551_v41  ;;  %1918 = vmatprep.subr.bf16.mxu0 %v2351_v2 }
 0x1e5   :  { %1949 = vmatprep.subr.bf16.mxu1 %v2351_v2 }
 0x1e7   :  { %1919 = vmatpush3.bf16.msra.mxu0 %v2557_v42 }
 0x1e8   :  { %1950 = vmatpush3.bf16.msra.mxu1 %v2559_v43  ;;  %1920 = vmatprep.subr.bf16.mxu0 %v2351_v2 }
 0x1e9   :  { %1951 = vmatprep.subr.bf16.mxu1 %v2351_v2 }
 0x1eb   :  { %1921 = vmatpush3.bf16.msra.mxu0 %v2565_v44 }
 0x1ec   :  { %1952 = vmatpush3.bf16.msra.mxu1 %v2567_v45  ;;  %1922 = vmatprep.subr.bf16.mxu0 %v2351_v2 }
 0x1ed   :  { %1953 = vmatprep.subr.bf16.mxu1 %v2351_v2 }
 0x1ef   :  { %1923 = vmatpush3.bf16.msra.mxu0 %v2573_v46 }
 0x1f0   :  { %1959 = vmatprep.subr.mxu0 %v2351_v2  ;;  %1954 = vmatpush3.bf16.msra.mxu1 %v2579_v47 }
 0x1f1   :  { %1990 = vmatprep.subr.mxu1 %v2351_v2 }
 0x24e   :  { %v218_v49 = vpop.xlane.xlu1 %217 }
 0x24f   :  { %v219_v53 = vadd.f32 %v218_v49, %v2583_v51 }
 0x251   :  { %2178 = vrsqrt.f32 %v219_v53 }
 0x252   :  { %v450_v52 = vpop.xlane.xlu1 %449 }
 0x253   :  { %v451_v54 = vadd.f32 %v450_v52, %v2583_v51  ;;  %v1775_v52 = vld [vmem:[%s2857_s6 + $0x1] ss:$0 sm:$0xff] }
 0x255   :  { %2180 = vrsqrt.f32 %v451_v54 }
 0x25b   :  { %v2179_v55 = vpop.eup %2178 }
 0x25c   :  { %v230_v57 = vmul.f32 %v2179_v55, %v2583_v51 }
 0x25e   :  { %v231_v59 = vmul.f32 %v230_v57, %v2472_v0 }
 0x25f   :  { %v2181_v56 = vpop.eup %2180 }
 0x260   :  { %v462_v58 = vmul.f32 %v2181_v56, %v2583_v51 }
 0x262   :  { %v463_v61 = vmul.f32 %v462_v58, %v2472_v0 }
 0x2a4   :  { %v274_v60 = vpop.f32.mrb[4].mxu0 }
 0x2a5   :  { %v280_v62 = vadd.f32 %v274_v60, %v231_v59  ;;  %v505_v63 = vpop.f32.mrb[4].mxu1  ;;  %v1906_v1 = vpop.f32.mrb[5].mxu0 }
 0x2a6   :  { %v511_v3 = vadd.f32 %v505_v63, %v463_v61  ;;  %v1937_v4 = vpop.f32.mrb[5].mxu1  ;;  %v277_v5 = vpop.f32.mrb[6].mxu0 }
 0x2a7   :  { %v281_v6 = vmul.f32 %v2179_v55, %v280_v62  ;;  %v508_v7 = vpop.f32.mrb[6].mxu1  ;;  %v1907_v9 = vpop.f32.mrb[7].mxu0 }
 0x2a8   :  { %v512_v10 = vmul.f32 %v2181_v56, %v511_v3  ;;  %v1938_v11 = vpop.f32.mrb[7].mxu1 }
 0x2a9   :  { %v282_v12 = vpack.c.bf16 %v281_v6, %v281_v6 }
 0x2aa   :  { %v513_v14 = vpack.c.bf16 %v512_v10, %v512_v10 }
 0x2ab   :  { %1925 = vmatmul.mubr.bf16.vlgmr.msra.gmra.mrb[8].mxu0 %v282_v12 }
 0x2ac   :  { %1956 = vmatmul.mubr.bf16.vlgmr.msra.gmra.mrb[8].mxu1 %v513_v14  ;;  %1960 = vmatpush3.xpose.msra.mxu0 %v1769_v13 }
 0x2ad   :  { %1991 = vmatpush3.xpose.msra.mxu1 %v1773_v15  ;;  %1961 = vmatprep.mubr.msk.f32.mxu0 %vm2352_vm0, %v2351_v2 }
 0x2ae   :  { %1992 = vmatprep.mubr.msk.f32.mxu1 %vm2352_vm0, %v2351_v2  ;;  %1964 = vmatprep.subr.bf16.mxu0 %v2351_v2 }
 0x2af   :  { %1995 = vmatprep.subr.bf16.mxu1 %v2351_v2 }
 0x2b3   :  { %1962 = vmatmul.mubr.f32.vlgmr.msra.gmra.mrb[2].mxu0 %v2491_v8 }
 0x2b4   :  { %1993 = vmatmul.mubr.f32.vlgmr.msra.gmra.mrb[2].mxu1 %v2491_v8  ;;  %1966 = vmatprep.mubr.msk.bf16.mxu0 %vm2352_vm0, %v2351_v2 }
 0x2b5   :  { %1997 = vmatprep.mubr.msk.bf16.mxu1 %vm2352_vm0, %v2351_v2  ;;  %1965 = vmatpush3.bf16.msra.mxu0 %v703_v18 }
 0x2b6   :  { %1996 = vmatpush3.bf16.msra.mxu1 %v889_v19  ;;  %1970 = vmatprep.subr.bf16.mxu0 %v2351_v2 }
 0x2b7   :  { %2001 = vmatprep.subr.bf16.mxu1 %v2351_v2 }
 0x37e   :  { %v365_v22 = vpop.f32.mrb[8].mxu0 }
 0x37f   :  { %v366_v23 = vadd.f32 %v365_v22, %v2616_v20  ;;  %v596_v24 = vpop.f32.mrb[8].mxu1  ;;  %v1926_v25 = vpop.f32.mrb[9].mxu0 }
 0x380   :  { %v597_v26 = vadd.f32 %v596_v24, %v2621_v21  ;;  %v1957_v27 = vpop.f32.mrb[9].mxu1  ;;  %v368_v28 = vpop.f32.mrb[10].mxu0 }
 0x381   :  { %2182 = vtanh.f32 %v366_v23  ;;  %v599_v29 = vpop.f32.mrb[10].mxu1  ;;  %v1927_v30 = vpop.f32.mrb[11].mxu0 }
 0x382   :  { %2184 = vtanh.f32 %v597_v26  ;;  %v1958_v31 = vpop.f32.mrb[11].mxu1 }
 0x386   :  { %v677_v49 = vpop.f32.mrb[2].mxu0 }
 0x387   :  { %v681_v50 = vmax.f32 %v677_v49, 0.0  ;;  %v863_v53 = vpop.f32.mrb[2].mxu1  ;;  %v1963_v54 = vpop.f32.mrb[3].mxu0 }
 0x388   :  { %v867_v55 = vmax.f32 %v863_v53, 0.0  ;;  %v1994_v56 = vpop.f32.mrb[3].mxu1  ;;  %v1777_v53 = vld [vmem:[%s2853_s2 + $0x4] sm:$0x3] }
 0x389   :  { %v693_v57 = vadd.f32 %v1771_v48, %v681_v50  ;;  %v682_v58 = vsel %vm215_vm2, %v681_v50, 0.0  ;;  %v978_v56 = vld [vmem:[#allocation2 + $0x2] sm:$0x1] }
 0x38a   :  { %v879_v59 = vadd.f32 %v1775_v52, %v867_v55  ;;  %v868_v60 = vsel %vm215_vm2, %v867_v55, 0.0  ;;  %683 = vadd.xlane.f32.xlu0 %v682_v58  ;;  %v1075_v58 = vsel %vm236_vm1, %v978_v56, 0 }
 0x38b   :  { %v2183_v61 = vpop.eup %2182  ;;  %2186 = vrsqrt.f32 %v693_v57  ;;  %869 = vadd.xlane.f32.xlu1 %v868_v60  ;;  %v1164_v57 = vld [vmem:[#allocation5 + $0x2] sm:$0x1] }
 0x38c   :  { %v2185_v62 = vpop.eup %2184  ;;  %v372_v63 = vmul.f32 0.7, %v2183_v61  ;;  %2188 = vrsqrt.f32 %v879_v59  ;;  %v1261_v59 = vsel %vm236_vm1, %v1164_v57, 0 }
 0x38d   :  { %v603_v1 = vmul.f32 0.3, %v2185_v62 }
 0x38f   :  { %v2633_v3 = vadd.f32 %v603_v1, %v372_v63 }
 0x395   :  { %v2187_v4 = vpop.eup %2186 }
 0x396   :  { %v2189_v5 = vpop.eup %2188  ;;  %v695_v6 = vmul.f32 %v2187_v4, %v681_v50 }
 0x397   :  { %v881_v7 = vmul.f32 %v2189_v5, %v867_v55  ;;  %v1781_v55 = vld [vmem:[%s2856_s5 + $0x4] sm:$0x3] }
 0x398   :  { %v698_v9 = vpack.c.bf16 %v695_v6, %v695_v6 }
 0x399   :  { %v884_v10 = vpack.c.bf16 %v881_v7, %v881_v7 }
 0x39a   :  { %1967 = vmatmul.mubr.msk.bf16.vlgmr.msra.gmra.mrb[12].mxu0 %vm215_vm2, %v698_v9 }
 0x39b   :  { %1998 = vmatmul.mubr.msk.bf16.vlgmr.msra.gmra.mrb[12].mxu1 %vm215_vm2, %v884_v10  ;;  %1971 = vmatpush3.bf16.msra.mxu0 %v2519_v32  ;;  %v1779_v10 = vld [vmem:[%s2854_s3 + $0x2] ss:$0 sm:$0xff] }
 0x39c   :  { %2002 = vmatpush3.bf16.msra.mxu1 %v2521_v33  ;;  %1972 = vmatprep.subr.bf16.mxu0 %v2351_v2 }
 0x39d   :  { %2003 = vmatprep.subr.bf16.mxu1 %v2351_v2  ;;  %1986 = vmatprep.mubr.msk.bf16.mxu0 %vm2352_vm0, %v2351_v2 }
 0x39e   :  { %2017 = vmatprep.mubr.msk.bf16.mxu1 %vm2352_vm0, %v2351_v2 }
 0x39f   :  { %1973 = vmatpush3.bf16.msra.mxu0 %v2525_v34 }
 0x3a0   :  { %2004 = vmatpush3.bf16.msra.mxu1 %v2527_v35  ;;  %1974 = vmatprep.subr.bf16.mxu0 %v2351_v2 }
 0x3a1   :  { %2005 = vmatprep.subr.bf16.mxu1 %v2351_v2 }
 0x3a3   :  { %1975 = vmatpush3.bf16.msra.mxu0 %v2533_v36 }
 0x3a4   :  { %2006 = vmatpush3.bf16.msra.mxu1 %v2535_v37  ;;  %1976 = vmatprep.subr.bf16.mxu0 %v2351_v2 }
 0x3a5   :  { %2007 = vmatprep.subr.bf16.mxu1 %v2351_v2 }
 0x3a7   :  { %1977 = vmatpush3.bf16.msra.mxu0 %v2541_v38 }
 0x3a8   :  { %2008 = vmatpush3.bf16.msra.mxu1 %v2543_v39  ;;  %1978 = vmatprep.subr.bf16.mxu0 %v2351_v2 }
 0x3a9   :  { %2009 = vmatprep.subr.bf16.mxu1 %v2351_v2 }
 0x3ab   :  { %1979 = vmatpush3.bf16.msra.mxu0 %v2549_v40 }
 0x3ac   :  { %2010 = vmatpush3.bf16.msra.mxu1 %v2551_v41  ;;  %1980 = vmatprep.subr.bf16.mxu0 %v2351_v2 }
 0x3ad   :  { %2011 = vmatprep.subr.bf16.mxu1 %v2351_v2 }
 0x3af   :  { %1981 = vmatpush3.bf16.msra.mxu0 %v2557_v42 }
 0x3b0   :  { %2012 = vmatpush3.bf16.msra.mxu1 %v2559_v43  ;;  %1982 = vmatprep.subr.bf16.mxu0 %v2351_v2 }
 0x3b1   :  { %2013 = vmatprep.subr.bf16.mxu1 %v2351_v2 }
 0x3b3   :  { %1983 = vmatpush3.bf16.msra.mxu0 %v2565_v44 }
 0x3b4   :  { %2014 = vmatpush3.bf16.msra.mxu1 %v2567_v45  ;;  %1984 = vmatprep.subr.bf16.mxu0 %v2351_v2 }
 0x3b5   :  { %2015 = vmatprep.subr.bf16.mxu1 %v2351_v2 }
 0x3b7   :  { %1985 = vmatpush3.bf16.msra.mxu0 %v2573_v46 }
 0x3b8   :  { %2016 = vmatpush3.bf16.msra.mxu1 %v2579_v47  ;;  %2021 = vmatprep.subr.mxu0 %v2351_v2 }
 0x3b9   :  { %2052 = vmatprep.subr.mxu1 %v2351_v2 }
 0x417   :  { %v684_v11 = vpop.xlane.xlu0 %683 }
 0x418   :  { %v870_v12 = vpop.xlane.xlu1 %869  ;;  %v685_v13 = vadd.f32 %v684_v11, %v2583_v51 }
 0x419   :  { %v871_v14 = vadd.f32 %v870_v12, %v2583_v51 }
 0x41a   :  { %2190 = vrsqrt.f32 %v685_v13  ;;  %v1783_v13 = vld [vmem:[%s2857_s6 + $0x2] ss:$0 sm:$0xff] }
 0x41b   :  { %2192 = vrsqrt.f32 %v871_v14 }
 0x424   :  { %v2191_v15 = vpop.eup %2190 }
 0x425   :  { %v2193_v16 = vpop.eup %2192  ;;  %v696_v17 = vmul.f32 %v2191_v15, %v2583_v51 }
 0x426   :  { %v882_v18 = vmul.f32 %v2193_v16, %v2583_v51 }
 0x427   :  { %v697_v19 = vmul.f32 %v696_v17, %v2472_v0 }
 0x428   :  { %v883_v23 = vmul.f32 %v882_v18, %v2472_v0 }
 0x46d   :  { %v739_v22 = vpop.f32.mrb[12].mxu0 }
 0x46e   :  { %v745_v24 = vadd.f32 %v739_v22, %v697_v19  ;;  %v925_v25 = vpop.f32.mrb[12].mxu1  ;;  %v1968_v26 = vpop.f32.mrb[13].mxu0 }
 0x46f   :  { %v931_v27 = vadd.f32 %v925_v25, %v883_v23  ;;  %v1999_v28 = vpop.f32.mrb[13].mxu1  ;;  %v742_v29 = vpop.f32.mrb[14].mxu0 }
 0x470   :  { %v746_v30 = vmul.f32 %v2191_v15, %v745_v24  ;;  %v928_v31 = vpop.f32.mrb[14].mxu1  ;;  %v1969_v48 = vpop.f32.mrb[15].mxu0 }
 0x471   :  { %v932_v49 = vmul.f32 %v2193_v16, %v931_v27  ;;  %v2000_v50 = vpop.f32.mrb[15].mxu1 }
 0x472   :  { %v747_v52 = vpack.c.bf16 %v746_v30, %v746_v30 }
 0x473   :  { %v933_v54 = vpack.c.bf16 %v932_v49, %v932_v49 }
 0x474   :  { %1987 = vmatmul.mubr.bf16.vlgmr.msra.gmra.mrb[16].mxu0 %v747_v52 }
 0x475   :  { %2018 = vmatmul.mubr.bf16.vlgmr.msra.gmra.mrb[16].mxu1 %v933_v54  ;;  %2022 = vmatpush3.xpose.msra.mxu0 %v1777_v53 }
 0x476   :  { %2053 = vmatpush3.xpose.msra.mxu1 %v1781_v55  ;;  %2023 = vmatprep.mubr.msk.f32.mxu0 %vm2352_vm0, %v2351_v2 }
 0x477   :  { %2054 = vmatprep.mubr.msk.f32.mxu1 %vm2352_vm0, %v2351_v2  ;;  %2026 = vmatprep.subr.bf16.mxu0 %v2351_v2 }
 0x478   :  { %2057 = vmatprep.subr.bf16.mxu1 %v2351_v2 }
 0x47c   :  { %2024 = vmatmul.mubr.f32.vlgmr.msra.gmra.mrb[20].mxu0 %v2491_v8 }
 0x47d   :  { %2055 = vmatmul.mubr.f32.vlgmr.msra.gmra.mrb[20].mxu1 %v2491_v8  ;;  %2028 = vmatprep.mubr.msk.bf16.mxu0 %vm2352_vm0, %v2351_v2 }
 0x47e   :  { %2059 = vmatprep.mubr.msk.bf16.mxu1 %vm2352_vm0, %v2351_v2  ;;  %2027 = vmatpush3.bf16.msra.mxu0 %v1075_v58 }
 0x47f   :  { %2058 = vmatpush3.bf16.msra.mxu1 %v1261_v59  ;;  %2032 = vmatprep.subr.bf16.mxu0 %v2351_v2 }
 0x480   :  { %2063 = vmatprep.subr.bf16.mxu1 %v2351_v2 }
 0x547   :  { %v782_v60 = vpop.f32.mrb[16].mxu0 }
 0x548   :  { %v783_v61 = vadd.f32 %v782_v60, %v2616_v20  ;;  %v968_v62 = vpop.f32.mrb[16].mxu1  ;;  %v1988_v63 = vpop.f32.mrb[17].mxu0 }
 0x549   :  { %v969_v1 = vadd.f32 %v968_v62, %v2621_v21  ;;  %v2019_v4 = vpop.f32.mrb[17].mxu1  ;;  %v785_v5 = vpop.f32.mrb[18].mxu0 }
 0x54a   :  { %2194 = vtanh.f32 %v783_v61  ;;  %v971_v6 = vpop.f32.mrb[18].mxu1  ;;  %v1989_v7 = vpop.f32.mrb[19].mxu0 }
 0x54b   :  { %2196 = vtanh.f32 %v969_v1  ;;  %v2020_v9 = vpop.f32.mrb[19].mxu1 }
 0x54f   :  { %v1049_v11 = vpop.f32.mrb[20].mxu0 }
 0x550   :  { %v1053_v12 = vmax.f32 %v1049_v11, 0.0  ;;  %v1235_v14 = vpop.f32.mrb[20].mxu1  ;;  %v2025_v15 = vpop.f32.mrb[21].mxu0 }
 0x551   :  { %v1239_v16 = vmax.f32 %v1235_v14, 0.0  ;;  %v2056_v17 = vpop.f32.mrb[21].mxu1  ;;  %v1785_v15 = vld [vmem:[%s2853_s2 + $0x6] sm:$0x3] }
 0x552   :  { %v1065_v18 = vadd.f32 %v1779_v10, %v1053_v12  ;;  %v1054_v19 = vsel %vm215_vm2, %v1053_v12, 0.0  ;;  %v1350_v17 = vld [vmem:[#allocation2 + $0x3] sm:$0x1] }
 0x553   :  { %v1251_v22 = vadd.f32 %v1783_v13, %v1239_v16  ;;  %v1240_v23 = vsel %vm215_vm2, %v1239_v16, 0.0  ;;  %1055 = vadd.xlane.f32.xlu0 %v1054_v19  ;;  %v1447_v19 = vsel %vm236_vm1, %v1350_v17, 0 }
 0x554   :  { %v2195_v24 = vpop.eup %2194  ;;  %2198 = vrsqrt.f32 %v1065_v18  ;;  %1241 = vadd.xlane.f32.xlu1 %v1240_v23  ;;  %v1536_v18 = vld [vmem:[#allocation5 + $0x3] sm:$0x1] }
 0x555   :  { %v2197_v25 = vpop.eup %2196  ;;  %v789_v26 = vmul.f32 0.7, %v2195_v24  ;;  %2200 = vrsqrt.f32 %v1251_v22  ;;  %v1633_v22 = vsel %vm236_vm1, %v1536_v18, 0 }
 0x556   :  { %v975_v28 = vmul.f32 0.3, %v2197_v25 }
 0x557   :  { %v790_v27 = vadd.f32 %v789_v26, %v2633_v3 }
 0x559   :  { %v2712_v29 = vadd.f32 %v975_v28, %v790_v27 }
 0x55e   :  { %v2199_v30 = vpop.eup %2198 }
 0x55f   :  { %v2201_v31 = vpop.eup %2200  ;;  %v1067_v48 = vmul.f32 %v2199_v30, %v1053_v12 }
 0x560   :  { %v1253_v49 = vmul.f32 %v2201_v31, %v1239_v16 }
 0x561   :  { %v1070_v50 = vpack.c.bf16 %v1067_v48, %v1067_v48 }
 0x562   :  { %v1256_v52 = vpack.c.bf16 %v1253_v49, %v1253_v49  ;;  %v1787_v49 = vld [vmem:[%s2854_s3 + $0x3] ss:$0 sm:$0xff] }
 0x563   :  { %2029 = vmatmul.mubr.msk.bf16.vlgmr.msra.gmra.mrb[24].mxu0 %vm215_vm2, %v1070_v50 }
 0x564   :  { %2060 = vmatmul.mubr.msk.bf16.vlgmr.msra.gmra.mrb[24].mxu1 %vm215_vm2, %v1256_v52  ;;  %2033 = vmatpush3.bf16.msra.mxu0 %v2519_v32 }
 0x565   :  { %2064 = vmatpush3.bf16.msra.mxu1 %v2521_v33  ;;  %2034 = vmatprep.subr.bf16.mxu0 %v2351_v2 }
 0x566   :  { %2065 = vmatprep.subr.bf16.mxu1 %v2351_v2  ;;  %2048 = vmatprep.mubr.msk.bf16.mxu0 %vm2352_vm0, %v2351_v2 }
 0x567   :  { %2079 = vmatprep.mubr.msk.bf16.mxu1 %vm2352_vm0, %v2351_v2 }
 0x568   :  { %2035 = vmatpush3.bf16.msra.mxu0 %v2525_v34 }
 0x569   :  { %2066 = vmatpush3.bf16.msra.mxu1 %v2527_v35  ;;  %2036 = vmatprep.subr.bf16.mxu0 %v2351_v2 }
 0x56a   :  { %2067 = vmatprep.subr.bf16.mxu1 %v2351_v2 }
 0x56c   :  { %2037 = vmatpush3.bf16.msra.mxu0 %v2533_v36 }
 0x56d   :  { %2068 = vmatpush3.bf16.msra.mxu1 %v2535_v37  ;;  %2038 = vmatprep.subr.bf16.mxu0 %v2351_v2 }
 0x56e   :  { %2069 = vmatprep.subr.bf16.mxu1 %v2351_v2 }
 0x570   :  { %2039 = vmatpush3.bf16.msra.mxu0 %v2541_v38 }
 0x571   :  { %2070 = vmatpush3.bf16.msra.mxu1 %v2543_v39  ;;  %2040 = vmatprep.subr.bf16.mxu0 %v2351_v2 }
 0x572   :  { %2071 = vmatprep.subr.bf16.mxu1 %v2351_v2 }
 0x574   :  { %2041 = vmatpush3.bf16.msra.mxu0 %v2549_v40 }
 0x575   :  { %2072 = vmatpush3.bf16.msra.mxu1 %v2551_v41  ;;  %2042 = vmatprep.subr.bf16.mxu0 %v2351_v2 }
 0x576   :  { %2073 = vmatprep.subr.bf16.mxu1 %v2351_v2 }
 0x578   :  { %2043 = vmatpush3.bf16.msra.mxu0 %v2557_v42 }
 0x579   :  { %2074 = vmatpush3.bf16.msra.mxu1 %v2559_v43  ;;  %2044 = vmatprep.subr.bf16.mxu0 %v2351_v2 }
 0x57a   :  { %2075 = vmatprep.subr.bf16.mxu1 %v2351_v2 }
 0x57c   :  { %2045 = vmatpush3.bf16.msra.mxu0 %v2565_v44 }
 0x57d   :  { %2076 = vmatpush3.bf16.msra.mxu1 %v2567_v45  ;;  %2046 = vmatprep.subr.bf16.mxu0 %v2351_v2 }
 0x57e   :  { %2077 = vmatprep.subr.bf16.mxu1 %v2351_v2 }
 0x580   :  { %2047 = vmatpush3.bf16.msra.mxu0 %v2573_v46 }
 0x581   :  { %2078 = vmatpush3.bf16.msra.mxu1 %v2579_v47  ;;  %2083 = vmatprep.subr.mxu0 %v2351_v2 }
 0x582   :  { %2114 = vmatprep.subr.mxu1 %v2351_v2 }
 0x5e0   :  { %v1056_v3 = vpop.xlane.xlu0 %1055 }
 0x5e1   :  { %v1242_v53 = vpop.xlane.xlu1 %1241  ;;  %v1057_v54 = vadd.f32 %v1056_v3, %v2583_v51  ;;  %v1791_v3 = vld [vmem:[%s2857_s6 + $0x3] ss:$0 sm:$0xff] }
 0x5e2   :  { %v1243_v55 = vadd.f32 %v1242_v53, %v2583_v51 }
 0x5e3   :  { %2202 = vrsqrt.f32 %v1057_v54 }
 0x5e4   :  { %2204 = vrsqrt.f32 %v1243_v55 }
 0x5ed   :  { %v2203_v56 = vpop.eup %2202 }
 0x5ee   :  { %v2205_v57 = vpop.eup %2204  ;;  %v1068_v58 = vmul.f32 %v2203_v56, %v2583_v51 }
 0x5ef   :  { %v1254_v59 = vmul.f32 %v2205_v57, %v2583_v51 }
 0x5f0   :  { %v1069_v60 = vmul.f32 %v1068_v58, %v2472_v0 }
 0x5f1   :  { %v1255_v62 = vmul.f32 %v1254_v59, %v2472_v0  ;;  %v1789_v0 = vld [vmem:[%s2856_s5 + $0x6] sm:$0x3] }
 0x636   :  { %v1111_v61 = vpop.f32.mrb[24].mxu0 }
 0x637   :  { %v1117_v63 = vadd.f32 %v1111_v61, %v1069_v60  ;;  %v1297_v1 = vpop.f32.mrb[24].mxu1  ;;  %v2030_v4 = vpop.f32.mrb[25].mxu0 }
 0x638   :  { %v1303_v5 = vadd.f32 %v1297_v1, %v1255_v62  ;;  %v2061_v6 = vpop.f32.mrb[25].mxu1  ;;  %v1114_v7 = vpop.f32.mrb[26].mxu0 }
 0x639   :  { %v1118_v9 = vmul.f32 %v2203_v56, %v1117_v63  ;;  %v1300_v10 = vpop.f32.mrb[26].mxu1  ;;  %v2031_v11 = vpop.f32.mrb[27].mxu0 }
 0x63a   :  { %v1304_v12 = vmul.f32 %v2205_v57, %v1303_v5  ;;  %v2062_v13 = vpop.f32.mrb[27].mxu1 }
 0x63b   :  { %v1119_v14 = vpack.c.bf16 %v1118_v9, %v1118_v9 }
 0x63c   :  { %v1305_v16 = vpack.c.bf16 %v1304_v12, %v1304_v12 }
 0x63d   :  { %2049 = vmatmul.mubr.bf16.vlgmr.msra.gmra.mrb[28].mxu0 %v1119_v14 }
 0x63e   :  { %2080 = vmatmul.mubr.bf16.vlgmr.msra.gmra.mrb[28].mxu1 %v1305_v16  ;;  %2084 = vmatpush3.xpose.msra.mxu0 %v1785_v15 }
 0x63f   :  { %2115 = vmatpush3.xpose.msra.mxu1 %v1789_v0  ;;  %2085 = vmatprep.mubr.msk.f32.mxu0 %vm2352_vm0, %v2351_v2 }
 0x640   :  { %2116 = vmatprep.mubr.msk.f32.mxu1 %vm2352_vm0, %v2351_v2  ;;  %2088 = vmatprep.subr.bf16.mxu0 %v2351_v2 }
 0x641   :  { %2119 = vmatprep.subr.bf16.mxu1 %v2351_v2 }
 0x645   :  { %2086 = vmatmul.mubr.f32.vlgmr.msra.gmra.mrb[22].mxu0 %v2491_v8 }
 0x646   :  { %2117 = vmatmul.mubr.f32.vlgmr.msra.gmra.mrb[22].mxu1 %v2491_v8  ;;  %2090 = vmatprep.mubr.msk.bf16.mxu0 %vm2352_vm0, %v2351_v2 }
 0x647   :  { %2121 = vmatprep.mubr.msk.bf16.mxu1 %vm2352_vm0, %v2351_v2  ;;  %2089 = vmatpush3.bf16.msra.mxu0 %v1447_v19 }
 0x648   :  { %2120 = vmatpush3.bf16.msra.mxu1 %v1633_v22  ;;  %2094 = vmatprep.subr.bf16.mxu0 %v2351_v2 }
 0x649   :  { %2125 = vmatprep.subr.bf16.mxu1 %v2351_v2 }
 0x710   :  { %v1154_v23 = vpop.f32.mrb[28].mxu0 }
 0x711   :  { %v1155_v8 = vadd.f32 %v1154_v23, %v2616_v20  ;;  %v1340_v24 = vpop.f32.mrb[28].mxu1  ;;  %v2050_v25 = vpop.f32.mrb[29].mxu0 }
 0x712   :  { %v1341_v26 = vadd.f32 %v1340_v24, %v2621_v21  ;;  %v2081_v27 = vpop.f32.mrb[29].mxu1  ;;  %v1157_v28 = vpop.f32.mrb[30].mxu0 }
 0x713   :  { %2206 = vtanh.f32 %v1155_v8  ;;  %v1343_v30 = vpop.f32.mrb[30].mxu1  ;;  %v2051_v31 = vpop.f32.mrb[31].mxu0 }
 0x714   :  { %2208 = vtanh.f32 %v1341_v26  ;;  %v2082_v48 = vpop.f32.mrb[31].mxu1 }
 0x718   :  { %v1421_v50 = vpop.f32.mrb[22].mxu0 }
 0x719   :  { %v1425_v52 = vmax.f32 %v1421_v50, 0.0  ;;  %v1607_v53 = vpop.f32.mrb[22].mxu1  ;;  %v2087_v54 = vpop.f32.mrb[23].mxu0 }
 0x71a   :  { %v1611_v55 = vmax.f32 %v1607_v53, 0.0  ;;  %v2118_v56 = vpop.f32.mrb[23].mxu1 }
 0x71b   :  { %v1437_v57 = vadd.f32 %v1787_v49, %v1425_v52  ;;  %v1426_v58 = vsel %vm215_vm2, %v1425_v52, 0.0 }
 0x71c   :  { %v1623_v59 = vadd.f32 %v1791_v3, %v1611_v55  ;;  %v1612_v60 = vsel %vm215_vm2, %v1611_v55, 0.0  ;;  %1427 = vadd.xlane.f32.xlu0 %v1426_v58 }
 0x71d   :  { %v2207_v61 = vpop.eup %2206  ;;  %2210 = vrsqrt.f32 %v1437_v57  ;;  %1613 = vadd.xlane.f32.xlu1 %v1612_v60 }
 0x71e   :  { %v2209_v62 = vpop.eup %2208  ;;  %v1161_v63 = vmul.f32 0.7, %v2207_v61  ;;  %2212 = vrsqrt.f32 %v1623_v59 }
 0x71f   :  { %v1347_v4 = vmul.f32 0.3, %v2209_v62 }
 0x720   :  { %v1162_v1 = vadd.f32 %v1161_v63, %v2712_v29 }
 0x722   :  { %v2791_v5 = vadd.f32 %v1347_v4, %v1162_v1 }
 0x727   :  { %v2211_v6 = vpop.eup %2210 }
 0x728   :  { %v2213_v7 = vpop.eup %2212  ;;  %v1439_v9 = vmul.f32 %v2211_v6, %v1425_v52 }
 0x729   :  { %v1625_v10 = vmul.f32 %v2213_v7, %v1611_v55 }
 0x72a   :  { %v1442_v11 = vpack.c.bf16 %v1439_v9, %v1439_v9 }
 0x72b   :  { %v1628_v12 = vpack.c.bf16 %v1625_v10, %v1625_v10 }
 0x72c   :  { %2091 = vmatmul.mubr.msk.bf16.vlgmr.msra.gmra.mrb[32].mxu0 %vm215_vm2, %v1442_v11 }
 0x72d   :  { %2122 = vmatmul.mubr.msk.bf16.vlgmr.msra.gmra.mrb[32].mxu1 %vm215_vm2, %v1628_v12  ;;  %2095 = vmatpush3.bf16.msra.mxu0 %v2519_v32 }
 0x72e   :  { %2126 = vmatpush3.bf16.msra.mxu1 %v2521_v33  ;;  %2096 = vmatprep.subr.bf16.mxu0 %v2351_v2 }
 0x72f   :  { %2127 = vmatprep.subr.bf16.mxu1 %v2351_v2  ;;  %2110 = vmatprep.mubr.msk.bf16.mxu0 %vm2352_vm0, %v2351_v2 }
 0x730   :  { %2141 = vmatprep.mubr.msk.bf16.mxu1 %vm2352_vm0, %v2351_v2 }
 0x731   :  { %2097 = vmatpush3.bf16.msra.mxu0 %v2525_v34 }
 0x732   :  { %2128 = vmatpush3.bf16.msra.mxu1 %v2527_v35  ;;  %2098 = vmatprep.subr.bf16.mxu0 %v2351_v2 }
 0x733   :  { %2129 = vmatprep.subr.bf16.mxu1 %v2351_v2 }
 0x735   :  { %2099 = vmatpush3.bf16.msra.mxu0 %v2533_v36 }
 0x736   :  { %2130 = vmatpush3.bf16.msra.mxu1 %v2535_v37  ;;  %2100 = vmatprep.subr.bf16.mxu0 %v2351_v2 }
 0x737   :  { %2131 = vmatprep.subr.bf16.mxu1 %v2351_v2 }
 0x739   :  { %2101 = vmatpush3.bf16.msra.mxu0 %v2541_v38 }
 0x73a   :  { %2132 = vmatpush3.bf16.msra.mxu1 %v2543_v39  ;;  %2102 = vmatprep.subr.bf16.mxu0 %v2351_v2 }
 0x73b   :  { %2133 = vmatprep.subr.bf16.mxu1 %v2351_v2 }
 0x73d   :  { %2103 = vmatpush3.bf16.msra.mxu0 %v2549_v40 }
 0x73e   :  { %2134 = vmatpush3.bf16.msra.mxu1 %v2551_v41  ;;  %2104 = vmatprep.subr.bf16.mxu0 %v2351_v2 }
 0x73f   :  { %2135 = vmatprep.subr.bf16.mxu1 %v2351_v2 }
 0x741   :  { %2105 = vmatpush3.bf16.msra.mxu0 %v2557_v42 }
 0x742   :  { %2136 = vmatpush3.bf16.msra.mxu1 %v2559_v43  ;;  %2106 = vmatprep.subr.bf16.mxu0 %v2351_v2 }
 0x743   :  { %2137 = vmatprep.subr.bf16.mxu1 %v2351_v2 }
 0x745   :  { %2107 = vmatpush3.bf16.msra.mxu0 %v2565_v44 }
 0x746   :  { %2138 = vmatpush3.bf16.msra.mxu1 %v2567_v45  ;;  %2108 = vmatprep.subr.bf16.mxu0 %v2351_v2 }
 0x747   :  { %2139 = vmatprep.subr.bf16.mxu1 %v2351_v2  ;;  %v2224_v2 = vld [vmem:[%s2851_s0] sm:$0xff]  ;;  %s2353_s0 = smov [#allocation10]  }
 0x748   :  { %s1738_s17 = sshll.u32 %s2353_s0, 4  ;;  %s1739_s17 = int_to_ptr.vmem [resolvable:$true] %s1738_s17 }
 0x749   :  { %2109 = vmatpush3.bf16.msra.mxu0 %v2573_v46  ;;  %s2313_s19 = scalar_lea.vmem %s1739_s17, 128  ;;  %p2318_p5 = scmp.lt.s32.totalorder %s1739_s17, %s1739_s17 }
 0x74a   :  { %2140 = vmatpush3.bf16.msra.mxu1 %v2579_v47  ;;  %p2314_p4 = scmp.ne.s32.totalorder %s1739_s17, %s2313_s19  ;;  %p2319_p6 = scmp.lt.s32.totalorder %s2313_s19, %s2313_s19 }
 0x74c   :  { %p2320_p7 = por %p2319_p6, %p2318_p5 }
 0x74e   :  { %p2321_p8 = pnand %p2320_p7, %p2314_p4 }
 0x7a9   :  { %v1428_v32 = vpop.xlane.xlu0 %1427 }
 0x7aa   :  { %v1614_v33 = vpop.xlane.xlu1 %1613  ;;  %v1429_v34 = vadd.f32 %v1428_v32, %v2583_v51 }
 0x7ab   :  { %v1615_v35 = vadd.f32 %v1614_v33, %v2583_v51 }
 0x7ac   :  { %2214 = vrsqrt.f32 %v1429_v34 }
 0x7ad   :  { %2216 = vrsqrt.f32 %v1615_v35 }
 0x7b6   :  { %v2215_v36 = vpop.eup %2214 }
 0x7b7   :  { %v2217_v37 = vpop.eup %2216  ;;  %v1440_v38 = vmul.f32 %v2215_v36, %v2583_v51 }
 0x7b8   :  { %v1626_v39 = vmul.f32 %v2217_v37, %v2583_v51 }
 0x7b9   :  { %v1441_v40 = vmul.f32 %v2224_v2, %v1440_v38 }
 0x7ba   :  { %v1627_v42 = vmul.f32 %v2224_v2, %v1626_v39 }
 0x7ff   :  { %v1483_v41 = vpop.f32.mrb[32].mxu0 }
 0x800   :  { %v1489_v43 = vadd.f32 %v1483_v41, %v1441_v40  ;;  %v1669_v44 = vpop.f32.mrb[32].mxu1  ;;  %v2092_v45 = vpop.f32.mrb[33].mxu0 }
 0x801   :  { %v1675_v46 = vadd.f32 %v1669_v44, %v1627_v42  ;;  %v2123_v47 = vpop.f32.mrb[33].mxu1  ;;  %v1486_v29 = vpop.f32.mrb[34].mxu0 }
 0x802   :  { %v1490_v13 = vmul.f32 %v2215_v36, %v1489_v43  ;;  %v1672_v14 = vpop.f32.mrb[34].mxu1  ;;  %v2093_v15 = vpop.f32.mrb[35].mxu0 }
 0x803   :  { %v1676_v16 = vmul.f32 %v2217_v37, %v1675_v46  ;;  %v2124_v0 = vpop.f32.mrb[35].mxu1 }
 0x804   :  { %v1491_v17 = vpack.c.bf16 %v1490_v13, %v1490_v13 }
 0x805   :  { %v1677_v51 = vpack.c.bf16 %v1676_v16, %v1676_v16 }
 0x806   :  { %2111 = vmatmul.mubr.bf16.vlgmr.msra.gmra.mrb[36].mxu0 %v1491_v17 }
 0x807   :  { %2142 = vmatmul.mubr.bf16.vlgmr.msra.gmra.mrb[36].mxu1 %v1677_v51 }
 0x8d9   :  { %v1526_v18 = vpop.f32.mrb[36].mxu0 }
 0x8da   :  { %v1527_v19 = vadd.f32 %v1526_v18, %v2616_v20  ;;  %v1712_v22 = vpop.f32.mrb[36].mxu1  ;;  %v2112_v23 = vpop.f32.mrb[37].mxu0  ;;  %v1722_v20 = vmul.f32 0.5, %v2224_v2 }
 0x8db   :  { %v1713_v8 = vadd.f32 %v1712_v22, %v2621_v21  ;;  %v2143_v24 = vpop.f32.mrb[37].mxu1  ;;  %v1529_v25 = vpop.f32.mrb[38].mxu0 }
 0x8dc   :  { %2218 = vtanh.f32 %v1527_v19  ;;  %v1715_v26 = vpop.f32.mrb[38].mxu1  ;;  %v2113_v27 = vpop.f32.mrb[39].mxu0 }
 0x8dd   :  { %2220 = vtanh.f32 %v1713_v8  ;;  %v2144_v28 = vpop.f32.mrb[39].mxu1 }
 0x8e6   :  { %v2219_v30 = vpop.eup %2218 }
 0x8e7   :  { %v2221_v31 = vpop.eup %2220  ;;  %v1533_v48 = vmul.f32 0.7, %v2219_v30 }
 0x8e8   :  { %v1719_v50 = vmul.f32 0.3, %v2221_v31 }
 0x8e9   :  { %v1534_v49 = vadd.f32 %v1533_v48, %v2791_v5 }
 0x8eb   :  { %v1720_v52 = vadd.f32 %v1719_v50, %v1534_v49 }
 0x8ed   :  { %v1721_v3 = vmul.f32 0.25, %v1720_v52 }
 0x8ef   :  { %v1723_v53 = vmul.f32 0.5, %v1721_v3 }
 0x8f1   :  { %v1724_v54 = vadd.f32 %v1723_v53, %v1722_v20 }
 0x8f3   :  { %v1725_v55 = vmul.f32 %v1724_v54, %v1724_v54 }
 0x8f5   :  { %1726 = vadd.xlane.f32.xlu0 %v1725_v55 }
 0x982   :  { %v1727_v21 = vpop.xlane.xlu0 %1726 }
 0x983   :  { %v1728_v56 = vmax.f32 %v1727_v21, 1e-24 }
 0x985   :  { %2222 = vrsqrt.f32 %v1728_v56 }
 0x98f   :  { %v2223_v57 = vpop.eup %2222 }
 0x990   :  { %v1730_v58 = vmul.f32 %v2223_v57, %v1724_v54 }
 0x992   :  { %1731 = vst [vmem:[#allocation10] sm:$0xff] %v1730_v58 }
 0x993   :  { %2324 = shalt.err (!%p2321_p8)
}
 0x994   :  { %s2325_s23 = scalar_lea.hbm %s2862_s11, 128 }
 0x995   :  { %p2326_p9 = scmp.ne.s32.totalorder %s2862_s11, %s2325_s23  ;;  %p2329_p10 = scmp.lt.u32.totalorder %s2325_s23, %s2862_s11 }
 0x997   :  { %p2331_p11 = pnand %p2329_p10, %p2326_p9 }
 0x999   :  { %2334 = shalt.err (!%p2331_p11)
}
 0x99a   :  { %1741 = dma.vmem_to_hbm [thread:$0]  %s1739_s17, 128, %s2862_s11, [#allocation4]  }
 0x99b   :  { %2341 = dma.done.wait [#allocation4], 128  }
 0x99c   :  { %2342 = vsyncadd [#allocation4], 4294967168 }
 0x99d   :  { %1745 = vsyncpa [#allocation3], 1 }
 0x99e   :  { %1746 = vsyncpa [#allocation6], 1 }
 0x99f   :  { %1747 = vsyncpa [#allocation9], 1 }
 0x9a0   :  { %1748 = vsyncpa [#allocation4], 1 }

</bundles_post_ra>
